<compile_context>
chip_gen: v5e
topology: v5e:2x2
jax: 0.10.0
libtpu: 0.0.40
codegen_flags: <defaults>
</compile_context>

<pallas_src>
import functools

import jax
import jax.numpy as jnp
import numpy as np
from jax import lax
from jax.experimental import pallas as pl
from jax.experimental.pallas import tpu as pltpu

# Small-shape configuration (original module: 63-bit code, BATCH_SIZE=120, Nc=25).
ROWS = 8      # variable nodes per graph
COLS = 4      # check nodes per graph
BATCH = 2     # BATCH_SIZE
NC = 3        # Nc message-passing iterations
DEG = 4       # variables per check (synthetic Tanner graph)

H_REAL = 10   # MLP hidden width (Linear 1 -> 10 -> 1)
E_PAD = 128   # padded per-graph edge count (lane axis)
V_PAD = 128   # padded per-graph variable-node count (lane axis)
B_TILE = 8    # batch rows per grid step (sublane axis)


def _gnni_kernel(nc, h_real,
                 s_var_ref, s_chk_ref, gvt_ref, mask_ref,
                 x_edge_ref, x_var_ref,
                 w1c_ref, b1c_ref, w2c_ref, b2c_ref,
                 w1o_ref, b1o_ref, w2o_ref, b2o_ref,
                 out_ref):
    s_var = s_var_ref[...]      # (E_PAD, E_PAD)  == S_var - I (per graph, zero-padded)
    s_chk = s_chk_ref[...]      # (E_PAD, E_PAD)  == S_chk - I
    x_edge = x_edge_ref[...]    # (B_TILE, E_PAD) prior at each edge's variable node

    # Scalar MLP weights live in SMEM; read once (hoisted out of the Nc loop).
    w1c = [w1c_ref[k] for k in range(h_real)]
    b1c = [b1c_ref[k] for k in range(h_real)]
    w2c = [w2c_ref[k] for k in range(h_real)]
    b2c = b2c_ref[0]
    w1o = [w1o_ref[k] for k in range(h_real)]
    b1o = [b1o_ref[k] for k in range(h_real)]
    w2o = [w2o_ref[k] for k in range(h_real)]
    b2o = b2o_ref[0]

    def mlp(v, w1, b1, w2, b2):
        # Elementwise Linear(1,10) -> ReLU -> Linear(10,1), unrolled over hidden
        # units; each step is a handful of VPU ops on a single (B_TILE, E_PAD) vreg.
        acc = jnp.zeros_like(v) + b2
        for k in range(h_real):
            acc = acc + w2[k] * jnp.maximum(w1[k] * v + b1[k], 0.0)
        return acc

    def body(_, m):
        # ggc1 (source_to_target): the "- m" is folded into (S_var - I).
        m1 = jnp.dot(m, s_var, preferred_element_type=jnp.float32) + x_edge
        # ggc2 (target_to_source): the "- t" is folded into (S_chk - I).
        t = jnp.tanh(m1 * 0.5)
        c = jnp.dot(t, s_chk, preferred_element_type=jnp.float32)
        # ggc2.mlp2 per edge + residual (m here is m_p of this iteration).
        return mlp(c, w1c, b1c, w2c, b2c) + m

    m = lax.fori_loop(0, nc, body, jnp.zeros_like(x_edge), unroll=True)

    # Padded edge lanes accumulate MLP-bias garbage; zero them before readout
    # (G^T's padded rows are already zero — this is cheap insurance).
    m = m * mask_ref[...]

    # Readout: scatter edge messages onto variable nodes, add prior, MLP,
    # sigmoid(-o), clamp.
    res = jnp.dot(m, gvt_ref[...], preferred_element_type=jnp.float32) + x_var_ref[...]
    o = mlp(res, w1o, b1o, w2o, b2o)
    p = 1.0 / (1.0 + jnp.exp(o))          # sigmoid(-o)
    out_ref[...] = jnp.clip(p, 1e-7, 1.0 - 1e-7)


def make_gnni_forward(edge_index, params, nc=NC):
    """Preprocess the Tanner graph ONCE (depends only on edge_index/params);
    return a jitted forward(x) that launches a single pallas_call."""
    src = np.asarray(edge_index[0], np.int64)
    dst = np.asarray(edge_index[1], np.int64)
    E = src.shape[0]
    nb = ROWS + COLS
    assert E % BATCH == 0
    e_g = E // BATCH
    assert e_g <= E_PAD and ROWS <= V_PAD

    # The decoder graph is the same Tanner graph replicated once per batch
    # element (block-diagonal edge_index) — verify and extract the per-graph copy.
    src_l = (src % nb).reshape(BATCH, e_g)
    dst_l = (dst % nb).reshape(BATCH, e_g)
    b_of = (src // nb).reshape(BATCH, e_g)
    assert np.all(b_of == np.arange(BATCH)[:, None]), "edges must be grouped per batch"
    assert np.all(src_l == src_l[:1]) and np.all(dst_l == dst_l[:1]), \
        "per-batch Tanner structure must be identical"
    src_g = src_l[0]            # edge -> variable node (local, 0..ROWS-1)
    dst_g = dst_l[0]            # edge -> check node    (local, ROWS..ROWS+COLS-1)

    # Per-graph structure matrices with "-I" baked in (zero-padded).
    s_var = np.zeros((E_PAD, E_PAD), np.float32)
    s_var[:e_g, :e_g] = ((src_g[:, None] == src_g[None, :]).astype(np.float32)
                         - np.eye(e_g, dtype=np.float32))
    s_chk = np.zeros((E_PAD, E_PAD), np.float32)
    s_chk[:e_g, :e_g] = ((dst_g[:, None] == dst_g[None, :]).astype(np.float32)
                         - np.eye(e_g, dtype=np.float32))

    gvt = np.zeros((E_PAD, V_PAD), np.float32)       # edge -> variable incidence (G^T)
    gvt[np.arange(e_g), src_g] = 1.0

    mask = np.zeros((1, E_PAD), np.float32)
    mask[0, :e_g] = 1.0

    b_pad = ((BATCH + B_TILE - 1) // B_TILE) * B_TILE
    n_btiles = b_pad // B_TILE

    # Gather indices for the per-call prior -> (batch, edge) / (batch, var) layout.
    edge_node_idx = jnp.asarray(
        np.arange(BATCH)[:, None] * nb + src_g[None, :], jnp.int32)              # (BATCH, e_g)
    var_node_idx = jnp.asarray(
        np.arange(BATCH)[:, None] * nb + np.arange(ROWS)[None, :], jnp.int32)    # (BATCH, ROWS)

    const_args = [jnp.asarray(a) for a in (s_var, s_chk, gvt, mask)]

    def flat(p):
        return jnp.asarray(p, jnp.float32).reshape(-1)

    weights = [flat(params["w1c"]), flat(params["b1c"]),
               flat(params["w2c"]), flat(params["b2c"]),
               flat(params["w1o"]), flat(params["b1o"]),
               flat(params["w2o"]), flat(params["b2o"])]

    def vmem_full(shape):
        return pl.BlockSpec(shape, lambda b: (0, 0))

    smem = pl.BlockSpec(memory_space=pltpu.MemorySpace.SMEM)

    grid_spec = pltpu.PrefetchScalarGridSpec(
        num_scalar_prefetch=0,
        grid=(n_btiles,),
        in_specs=[
            vmem_full((E_PAD, E_PAD)),                          # S_var - I
            vmem_full((E_PAD, E_PAD)),                          # S_chk - I
            vmem_full((E_PAD, V_PAD)),                          # G^T
            vmem_full((1, E_PAD)),                              # edge mask
            pl.BlockSpec((B_TILE, E_PAD), lambda b: (b, 0)),    # x_edge (batch-tiled)
            pl.BlockSpec((B_TILE, V_PAD), lambda b: (b, 0)),    # x_var  (batch-tiled)
        ] + [smem] * 8,                                         # scalar MLP weights
        out_specs=pl.BlockSpec((B_TILE, V_PAD), lambda b: (b, 0)),
    )

    call = pl.pallas_call(
        functools.partial(_gnni_kernel, nc, H_REAL),
        out_shape=jax.ShapeDtypeStruct((b_pad, V_PAD), jnp.float32),
        grid_spec=grid_spec,
        compiler_params=pltpu.CompilerParams(
            dimension_semantics=("parallel",)),   # v7x: both TCs split the batch grid
    )

    @jax.jit
    def forward(x):
        xf = jnp.asarray(x, jnp.float32).reshape(-1)
        x_edge = jnp.zeros((b_pad, E_PAD), jnp.float32).at[:BATCH, :e_g].set(xf[edge_node_idx])
        x_var = jnp.zeros((b_pad, V_PAD), jnp.float32).at[:BATCH, :ROWS].set(xf[var_node_idx])
        out = call(*const_args, x_edge, x_var, *weights)
        # (batch-major, variable-minor) matches the module's row ordering.
        return out[:BATCH, :ROWS].reshape(BATCH * ROWS, 1)

    return forward


def gnni_forward_ref(x, edge_index, params):
    """Pure-JAX reference reproducing the PyTorch forward exactly."""
    x = jnp.asarray(x, jnp.float32)
    src = jnp.asarray(edge_index[0])
    dst = jnp.asarray(edge_index[1])
    N = (ROWS + COLS) * BATCH
    w1c = jnp.asarray(params["w1c"]); b1c = jnp.asarray(params["b1c"])
    w2c = jnp.asarray(params["w2c"]); b2c = jnp.asarray(params["b2c"])
    w1o = jnp.asarray(params["w1o"]); b1o = jnp.asarray(params["b1o"])
    w2o = jnp.asarray(params["w2o"]); b2o = jnp.asarray(params["b2o"])

    E = src.shape[0]
    m = jnp.zeros((E, 1), jnp.float32)
    for _ in range(NC):
        m_p = m
        s = jnp.zeros((N, 1), jnp.float32).at[src].add(m)
        m1 = s[src] - m + x[src]
        t = jnp.tanh(m1 / 2.0)
        sc = jnp.zeros((N, 1), jnp.float32).at[dst].add(t)
        c = sc[dst] - t
        h = jnp.maximum(c @ w1c.T + b1c, 0.0)
        u = h @ w2c.T + b2c
        m = u + m_p

    res = jnp.zeros((N, 1), jnp.float32).at[src].add(m) + x
    var_rows = jnp.concatenate(
        [jnp.arange(ROWS) + b * (ROWS + COLS) for b in range(BATCH)])
    tmp = res[var_rows]
    h = jnp.maximum(tmp @ w1o.T + b1o, 0.0)
    o = h @ w2o.T + b2o
    p = jax.nn.sigmoid(-o)
    return jnp.clip(p, 1e-7, 1.0 - 1e-7)


def _init_linear(key, in_f, out_f):
    kw, kb = jax.random.split(key)
    bound = 1.0 / np.sqrt(in_f)
    w = jax.random.uniform(kw, (out_f, in_f), jnp.float32, -bound, bound)
    b = jax.random.uniform(kb, (out_f,), jnp.float32, -bound, bound)
    return w, b


def _build_graph():
    src, dst = [], []
    for b in range(BATCH):
        off = b * (ROWS + COLS)
        for c in range(COLS):
            for k in range(DEG):
                v = (2 * c + k) % ROWS
                src.append(off + v)
                dst.append(off + ROWS + c)
    return np.array([src, dst], dtype=np.int32)


if __name__ == "__main__":
    key = jax.random.PRNGKey(0)
    k_x, k1, k2, k3, k4 = jax.random.split(key, 5)

    N = (ROWS + COLS) * BATCH
    x = jax.random.normal(k_x, (N, 1), jnp.float32)       # node priors (data.x)
    edge_index = _build_graph()                            # (2, E)

    # Deterministic parameters (only the submodules used by forward):
    # ggc2.mlp2: Linear(1,10) -> ReLU -> Linear(10,1);  GNNI.mlp: same shape.
    w1c, b1c = _init_linear(k1, 1, 10)
    w2c, b2c = _init_linear(k2, 10, 1)
    w1o, b1o = _init_linear(k3, 1, 10)
    w2o, b2o = _init_linear(k4, 10, 1)
    params = dict(w1c=w1c, b1c=b1c, w2c=w2c, b2c=b2c,
                  w1o=w1o, b1o=b1o, w2o=w2o, b2o=b2o)

    forward = make_gnni_forward(edge_index, params)        # graph preprocessing cached here
    out_kernel = forward(x)
    jax.block_until_ready(out_kernel)

    out_ref = gnni_forward_ref(x, edge_index, params)
    np.testing.assert_allclose(np.asarray(out_kernel), np.asarray(out_ref),
                               rtol=1e-5, atol=1e-5)
    print("KERNEL_OK")
</pallas_src>

<mosaic_0001>
module attributes {stable_mosaic.version = 11 : i64} {
  func.func @_gnni_kernel(%arg0: i32, %arg1: memref<128x128xf32, #tpu.memory_space<vmem>>, %arg2: memref<128x128xf32, #tpu.memory_space<vmem>>, %arg3: memref<128x128xf32, #tpu.memory_space<vmem>>, %arg4: memref<1x128xf32, #tpu.memory_space<vmem>>, %arg5: memref<8x128xf32, #tpu.memory_space<vmem>>, %arg6: memref<8x128xf32, #tpu.memory_space<vmem>>, %arg7: memref<10xf32, #tpu.memory_space<smem>>, %arg8: memref<10xf32, #tpu.memory_space<smem>>, %arg9: memref<10xf32, #tpu.memory_space<smem>>, %arg10: memref<1xf32, #tpu.memory_space<smem>>, %arg11: memref<10xf32, #tpu.memory_space<smem>>, %arg12: memref<10xf32, #tpu.memory_space<smem>>, %arg13: memref<10xf32, #tpu.memory_space<smem>>, %arg14: memref<1xf32, #tpu.memory_space<smem>>, %arg15: memref<8x128xf32, #tpu.memory_space<vmem>>) attributes {dimension_semantics = [#tpu.dimension_semantics<parallel>], iteration_bounds = array<i64: 1>, scalar_prefetch = 0 : i64, scratch_operands = 0 : i64, tpu.core_type = #tpu.core_type<tc>, window_params = [{pipeline_mode = #tpu.pipeline_mode<synchronous>, transform_indices = @transform_0, window_bounds = array<i64: 128, 128>}, {pipeline_mode = #tpu.pipeline_mode<synchronous>, transform_indices = @transform_1, window_bounds = array<i64: 128, 128>}, {pipeline_mode = #tpu.pipeline_mode<synchronous>, transform_indices = @transform_2, window_bounds = array<i64: 128, 128>}, {pipeline_mode = #tpu.pipeline_mode<synchronous>, transform_indices = @transform_3, window_bounds = array<i64: 1, 128>}, {transform_indices = @transform_4, window_bounds = array<i64: 8, 128>}, {transform_indices = @transform_5, window_bounds = array<i64: 8, 128>}, {transform_indices = @transform_6, window_bounds = array<i64: 10>}, {transform_indices = @transform_7, window_bounds = array<i64: 10>}, {transform_indices = @transform_8, window_bounds = array<i64: 10>}, {transform_indices = @transform_9, window_bounds = array<i64: 1>}, {transform_indices = @transform_10, window_bounds = array<i64: 10>}, {transform_indices = @transform_11, window_bounds = array<i64: 10>}, {transform_indices = @transform_12, window_bounds = array<i64: 10>}, {transform_indices = @transform_13, window_bounds = array<i64: 1>}, {transform_indices = @transform_14, window_bounds = array<i64: 8, 128>}]} {
    %c0 = arith.constant 0 : index
    %c0_0 = arith.constant 0 : index
    %0 = vector.load %arg1[%c0, %c0_0] : memref<128x128xf32, #tpu.memory_space<vmem>>, vector<128x128xf32>
    %c0_1 = arith.constant 0 : index
    %c0_2 = arith.constant 0 : index
    %1 = vector.load %arg2[%c0_1, %c0_2] : memref<128x128xf32, #tpu.memory_space<vmem>>, vector<128x128xf32>
    %c0_3 = arith.constant 0 : index
    %c0_4 = arith.constant 0 : index
    %2 = vector.load %arg5[%c0_3, %c0_4] : memref<8x128xf32, #tpu.memory_space<vmem>>, vector<8x128xf32>
    %c0_5 = arith.constant 0 : index
    %3 = memref.load %arg7[%c0_5] : memref<10xf32, #tpu.memory_space<smem>>
    %c1 = arith.constant 1 : index
    %4 = memref.load %arg7[%c1] : memref<10xf32, #tpu.memory_space<smem>>
    %c2 = arith.constant 2 : index
    %5 = memref.load %arg7[%c2] : memref<10xf32, #tpu.memory_space<smem>>
    %c3 = arith.constant 3 : index
    %6 = memref.load %arg7[%c3] : memref<10xf32, #tpu.memory_space<smem>>
    %c4 = arith.constant 4 : index
    %7 = memref.load %arg7[%c4] : memref<10xf32, #tpu.memory_space<smem>>
    %c5 = arith.constant 5 : index
    %8 = memref.load %arg7[%c5] : memref<10xf32, #tpu.memory_space<smem>>
    %c6 = arith.constant 6 : index
    %9 = memref.load %arg7[%c6] : memref<10xf32, #tpu.memory_space<smem>>
    %c7 = arith.constant 7 : index
    %10 = memref.load %arg7[%c7] : memref<10xf32, #tpu.memory_space<smem>>
    %c8 = arith.constant 8 : index
    %11 = memref.load %arg7[%c8] : memref<10xf32, #tpu.memory_space<smem>>
    %c9 = arith.constant 9 : index
    %12 = memref.load %arg7[%c9] : memref<10xf32, #tpu.memory_space<smem>>
    %c0_6 = arith.constant 0 : index
    %13 = memref.load %arg8[%c0_6] : memref<10xf32, #tpu.memory_space<smem>>
    %c1_7 = arith.constant 1 : index
    %14 = memref.load %arg8[%c1_7] : memref<10xf32, #tpu.memory_space<smem>>
    %c2_8 = arith.constant 2 : index
    %15 = memref.load %arg8[%c2_8] : memref<10xf32, #tpu.memory_space<smem>>
    %c3_9 = arith.constant 3 : index
    %16 = memref.load %arg8[%c3_9] : memref<10xf32, #tpu.memory_space<smem>>
    %c4_10 = arith.constant 4 : index
    %17 = memref.load %arg8[%c4_10] : memref<10xf32, #tpu.memory_space<smem>>
    %c5_11 = arith.constant 5 : index
    %18 = memref.load %arg8[%c5_11] : memref<10xf32, #tpu.memory_space<smem>>
    %c6_12 = arith.constant 6 : index
    %19 = memref.load %arg8[%c6_12] : memref<10xf32, #tpu.memory_space<smem>>
    %c7_13 = arith.constant 7 : index
    %20 = memref.load %arg8[%c7_13] : memref<10xf32, #tpu.memory_space<smem>>
    %c8_14 = arith.constant 8 : index
    %21 = memref.load %arg8[%c8_14] : memref<10xf32, #tpu.memory_space<smem>>
    %c9_15 = arith.constant 9 : index
    %22 = memref.load %arg8[%c9_15] : memref<10xf32, #tpu.memory_space<smem>>
    %c0_16 = arith.constant 0 : index
    %23 = memref.load %arg9[%c0_16] : memref<10xf32, #tpu.memory_space<smem>>
    %c1_17 = arith.constant 1 : index
    %24 = memref.load %arg9[%c1_17] : memref<10xf32, #tpu.memory_space<smem>>
    %c2_18 = arith.constant 2 : index
    %25 = memref.load %arg9[%c2_18] : memref<10xf32, #tpu.memory_space<smem>>
    %c3_19 = arith.constant 3 : index
    %26 = memref.load %arg9[%c3_19] : memref<10xf32, #tpu.memory_space<smem>>
    %c4_20 = arith.constant 4 : index
    %27 = memref.load %arg9[%c4_20] : memref<10xf32, #tpu.memory_space<smem>>
    %c5_21 = arith.constant 5 : index
    %28 = memref.load %arg9[%c5_21] : memref<10xf32, #tpu.memory_space<smem>>
    %c6_22 = arith.constant 6 : index
    %29 = memref.load %arg9[%c6_22] : memref<10xf32, #tpu.memory_space<smem>>
    %c7_23 = arith.constant 7 : index
    %30 = memref.load %arg9[%c7_23] : memref<10xf32, #tpu.memory_space<smem>>
    %c8_24 = arith.constant 8 : index
    %31 = memref.load %arg9[%c8_24] : memref<10xf32, #tpu.memory_space<smem>>
    %c9_25 = arith.constant 9 : index
    %32 = memref.load %arg9[%c9_25] : memref<10xf32, #tpu.memory_space<smem>>
    %c0_26 = arith.constant 0 : index
    %33 = memref.load %arg10[%c0_26] : memref<1xf32, #tpu.memory_space<smem>>
    %c0_27 = arith.constant 0 : index
    %34 = memref.load %arg11[%c0_27] : memref<10xf32, #tpu.memory_space<smem>>
    %c1_28 = arith.constant 1 : index
    %35 = memref.load %arg11[%c1_28] : memref<10xf32, #tpu.memory_space<smem>>
    %c2_29 = arith.constant 2 : index
    %36 = memref.load %arg11[%c2_29] : memref<10xf32, #tpu.memory_space<smem>>
    %c3_30 = arith.constant 3 : index
    %37 = memref.load %arg11[%c3_30] : memref<10xf32, #tpu.memory_space<smem>>
    %c4_31 = arith.constant 4 : index
    %38 = memref.load %arg11[%c4_31] : memref<10xf32, #tpu.memory_space<smem>>
    %c5_32 = arith.constant 5 : index
    %39 = memref.load %arg11[%c5_32] : memref<10xf32, #tpu.memory_space<smem>>
    %c6_33 = arith.constant 6 : index
    %40 = memref.load %arg11[%c6_33] : memref<10xf32, #tpu.memory_space<smem>>
    %c7_34 = arith.constant 7 : index
    %41 = memref.load %arg11[%c7_34] : memref<10xf32, #tpu.memory_space<smem>>
    %c8_35 = arith.constant 8 : index
    %42 = memref.load %arg11[%c8_35] : memref<10xf32, #tpu.memory_space<smem>>
    %c9_36 = arith.constant 9 : index
    %43 = memref.load %arg11[%c9_36] : memref<10xf32, #tpu.memory_space<smem>>
    %c0_37 = arith.constant 0 : index
    %44 = memref.load %arg12[%c0_37] : memref<10xf32, #tpu.memory_space<smem>>
    %c1_38 = arith.constant 1 : index
    %45 = memref.load %arg12[%c1_38] : memref<10xf32, #tpu.memory_space<smem>>
    %c2_39 = arith.constant 2 : index
    %46 = memref.load %arg12[%c2_39] : memref<10xf32, #tpu.memory_space<smem>>
    %c3_40 = arith.constant 3 : index
    %47 = memref.load %arg12[%c3_40] : memref<10xf32, #tpu.memory_space<smem>>
    %c4_41 = arith.constant 4 : index
    %48 = memref.load %arg12[%c4_41] : memref<10xf32, #tpu.memory_space<smem>>
    %c5_42 = arith.constant 5 : index
    %49 = memref.load %arg12[%c5_42] : memref<10xf32, #tpu.memory_space<smem>>
    %c6_43 = arith.constant 6 : index
    %50 = memref.load %arg12[%c6_43] : memref<10xf32, #tpu.memory_space<smem>>
    %c7_44 = arith.constant 7 : index
    %51 = memref.load %arg12[%c7_44] : memref<10xf32, #tpu.memory_space<smem>>
    %c8_45 = arith.constant 8 : index
    %52 = memref.load %arg12[%c8_45] : memref<10xf32, #tpu.memory_space<smem>>
    %c9_46 = arith.constant 9 : index
    %53 = memref.load %arg12[%c9_46] : memref<10xf32, #tpu.memory_space<smem>>
    %c0_47 = arith.constant 0 : index
    %54 = memref.load %arg13[%c0_47] : memref<10xf32, #tpu.memory_space<smem>>
    %c1_48 = arith.constant 1 : index
    %55 = memref.load %arg13[%c1_48] : memref<10xf32, #tpu.memory_space<smem>>
    %c2_49 = arith.constant 2 : index
    %56 = memref.load %arg13[%c2_49] : memref<10xf32, #tpu.memory_space<smem>>
    %c3_50 = arith.constant 3 : index
    %57 = memref.load %arg13[%c3_50] : memref<10xf32, #tpu.memory_space<smem>>
    %c4_51 = arith.constant 4 : index
    %58 = memref.load %arg13[%c4_51] : memref<10xf32, #tpu.memory_space<smem>>
    %c5_52 = arith.constant 5 : index
    %59 = memref.load %arg13[%c5_52] : memref<10xf32, #tpu.memory_space<smem>>
    %c6_53 = arith.constant 6 : index
    %60 = memref.load %arg13[%c6_53] : memref<10xf32, #tpu.memory_space<smem>>
    %c7_54 = arith.constant 7 : index
    %61 = memref.load %arg13[%c7_54] : memref<10xf32, #tpu.memory_space<smem>>
    %c8_55 = arith.constant 8 : index
    %62 = memref.load %arg13[%c8_55] : memref<10xf32, #tpu.memory_space<smem>>
    %c9_56 = arith.constant 9 : index
    %63 = memref.load %arg13[%c9_56] : memref<10xf32, #tpu.memory_space<smem>>
    %c0_57 = arith.constant 0 : index
    %64 = memref.load %arg14[%c0_57] : memref<1xf32, #tpu.memory_space<smem>>
    %cst = arith.constant 0.000000e+00 : f32
    %65 = vector.broadcast %cst : f32 to vector<8x128xf32>
    %c0_i32 = arith.constant 0 : i32
    %cst_58 = arith.constant dense<0.000000e+00> : vector<8x128xf32>
    %66 = tpu.matmul %65, %0, %cst_58 {dimension_numbers = #tpu.dot_dimension_numbers<[1], [0], [0], [1], [0, 0, 1, 1], [], []>} : vector<8x128xf32>, vector<128x128xf32>, vector<8x128xf32> -> vector<8x128xf32>
    %67 = arith.addf %66, %2 : vector<8x128xf32>
    %cst_59 = arith.constant 5.000000e-01 : f32
    %68 = vector.broadcast %cst_59 : f32 to vector<8x128xf32>
    %69 = arith.mulf %67, %68 : vector<8x128xf32>
    %70 = math.tanh %69 : vector<8x128xf32>
    %cst_60 = arith.constant dense<0.000000e+00> : vector<8x128xf32>
    %71 = tpu.matmul %70, %1, %cst_60 {dimension_numbers = #tpu.dot_dimension_numbers<[1], [0], [0], [1], [0, 0, 1, 1], [], []>} : vector<8x128xf32>, vector<128x128xf32>, vector<8x128xf32> -> vector<8x128xf32>
    %cst_61 = arith.constant 0.000000e+00 : f32
    %72 = vector.broadcast %cst_61 : f32 to vector<8x128xf32>
    %73 = vector.broadcast %33 : f32 to vector<8x128xf32>
    %74 = arith.addf %72, %73 : vector<8x128xf32>
    %75 = vector.broadcast %3 : f32 to vector<8x128xf32>
    %76 = arith.mulf %75, %71 : vector<8x128xf32>
    %77 = vector.broadcast %13 : f32 to vector<8x128xf32>
    %78 = arith.addf %76, %77 : vector<8x128xf32>
    %cst_62 = arith.constant 0.000000e+00 : f32
    %79 = vector.broadcast %cst_62 : f32 to vector<8x128xf32>
    %80 = arith.maximumf %78, %79 : vector<8x128xf32>
    %81 = vector.broadcast %23 : f32 to vector<8x128xf32>
    %82 = arith.mulf %81, %80 : vector<8x128xf32>
    %83 = arith.addf %74, %82 : vector<8x128xf32>
    %84 = vector.broadcast %4 : f32 to vector<8x128xf32>
    %85 = arith.mulf %84, %71 : vector<8x128xf32>
    %86 = vector.broadcast %14 : f32 to vector<8x128xf32>
    %87 = arith.addf %85, %86 : vector<8x128xf32>
    %cst_63 = arith.constant 0.000000e+00 : f32
    %88 = vector.broadcast %cst_63 : f32 to vector<8x128xf32>
    %89 = arith.maximumf %87, %88 : vector<8x128xf32>
    %90 = vector.broadcast %24 : f32 to vector<8x128xf32>
    %91 = arith.mulf %90, %89 : vector<8x128xf32>
    %92 = arith.addf %83, %91 : vector<8x128xf32>
    %93 = vector.broadcast %5 : f32 to vector<8x128xf32>
    %94 = arith.mulf %93, %71 : vector<8x128xf32>
    %95 = vector.broadcast %15 : f32 to vector<8x128xf32>
    %96 = arith.addf %94, %95 : vector<8x128xf32>
    %cst_64 = arith.constant 0.000000e+00 : f32
    %97 = vector.broadcast %cst_64 : f32 to vector<8x128xf32>
    %98 = arith.maximumf %96, %97 : vector<8x128xf32>
    %99 = vector.broadcast %25 : f32 to vector<8x128xf32>
    %100 = arith.mulf %99, %98 : vector<8x128xf32>
    %101 = arith.addf %92, %100 : vector<8x128xf32>
    %102 = vector.broadcast %6 : f32 to vector<8x128xf32>
    %103 = arith.mulf %102, %71 : vector<8x128xf32>
    %104 = vector.broadcast %16 : f32 to vector<8x128xf32>
    %105 = arith.addf %103, %104 : vector<8x128xf32>
    %cst_65 = arith.constant 0.000000e+00 : f32
    %106 = vector.broadcast %cst_65 : f32 to vector<8x128xf32>
    %107 = arith.maximumf %105, %106 : vector<8x128xf32>
    %108 = vector.broadcast %26 : f32 to vector<8x128xf32>
    %109 = arith.mulf %108, %107 : vector<8x128xf32>
    %110 = arith.addf %101, %109 : vector<8x128xf32>
    %111 = vector.broadcast %7 : f32 to vector<8x128xf32>
    %112 = arith.mulf %111, %71 : vector<8x128xf32>
    %113 = vector.broadcast %17 : f32 to vector<8x128xf32>
    %114 = arith.addf %112, %113 : vector<8x128xf32>
    %cst_66 = arith.constant 0.000000e+00 : f32
    %115 = vector.broadcast %cst_66 : f32 to vector<8x128xf32>
    %116 = arith.maximumf %114, %115 : vector<8x128xf32>
    %117 = vector.broadcast %27 : f32 to vector<8x128xf32>
    %118 = arith.mulf %117, %116 : vector<8x128xf32>
    %119 = arith.addf %110, %118 : vector<8x128xf32>
    %120 = vector.broadcast %8 : f32 to vector<8x128xf32>
    %121 = arith.mulf %120, %71 : vector<8x128xf32>
    %122 = vector.broadcast %18 : f32 to vector<8x128xf32>
    %123 = arith.addf %121, %122 : vector<8x128xf32>
    %cst_67 = arith.constant 0.000000e+00 : f32
    %124 = vector.broadcast %cst_67 : f32 to vector<8x128xf32>
    %125 = arith.maximumf %123, %124 : vector<8x128xf32>
    %126 = vector.broadcast %28 : f32 to vector<8x128xf32>
    %127 = arith.mulf %126, %125 : vector<8x128xf32>
    %128 = arith.addf %119, %127 : vector<8x128xf32>
    %129 = vector.broadcast %9 : f32 to vector<8x128xf32>
    %130 = arith.mulf %129, %71 : vector<8x128xf32>
    %131 = vector.broadcast %19 : f32 to vector<8x128xf32>
    %132 = arith.addf %130, %131 : vector<8x128xf32>
    %cst_68 = arith.constant 0.000000e+00 : f32
    %133 = vector.broadcast %cst_68 : f32 to vector<8x128xf32>
    %134 = arith.maximumf %132, %133 : vector<8x128xf32>
    %135 = vector.broadcast %29 : f32 to vector<8x128xf32>
    %136 = arith.mulf %135, %134 : vector<8x128xf32>
    %137 = arith.addf %128, %136 : vector<8x128xf32>
    %138 = vector.broadcast %10 : f32 to vector<8x128xf32>
    %139 = arith.mulf %138, %71 : vector<8x128xf32>
    %140 = vector.broadcast %20 : f32 to vector<8x128xf32>
    %141 = arith.addf %139, %140 : vector<8x128xf32>
    %cst_69 = arith.constant 0.000000e+00 : f32
    %142 = vector.broadcast %cst_69 : f32 to vector<8x128xf32>
    %143 = arith.maximumf %141, %142 : vector<8x128xf32>
    %144 = vector.broadcast %30 : f32 to vector<8x128xf32>
    %145 = arith.mulf %144, %143 : vector<8x128xf32>
    %146 = arith.addf %137, %145 : vector<8x128xf32>
    %147 = vector.broadcast %11 : f32 to vector<8x128xf32>
    %148 = arith.mulf %147, %71 : vector<8x128xf32>
    %149 = vector.broadcast %21 : f32 to vector<8x128xf32>
    %150 = arith.addf %148, %149 : vector<8x128xf32>
    %cst_70 = arith.constant 0.000000e+00 : f32
    %151 = vector.broadcast %cst_70 : f32 to vector<8x128xf32>
    %152 = arith.maximumf %150, %151 : vector<8x128xf32>
    %153 = vector.broadcast %31 : f32 to vector<8x128xf32>
    %154 = arith.mulf %153, %152 : vector<8x128xf32>
    %155 = arith.addf %146, %154 : vector<8x128xf32>
    %156 = vector.broadcast %12 : f32 to vector<8x128xf32>
    %157 = arith.mulf %156, %71 : vector<8x128xf32>
    %158 = vector.broadcast %22 : f32 to vector<8x128xf32>
    %159 = arith.addf %157, %158 : vector<8x128xf32>
    %cst_71 = arith.constant 0.000000e+00 : f32
    %160 = vector.broadcast %cst_71 : f32 to vector<8x128xf32>
    %161 = arith.maximumf %159, %160 : vector<8x128xf32>
    %162 = vector.broadcast %32 : f32 to vector<8x128xf32>
    %163 = arith.mulf %162, %161 : vector<8x128xf32>
    %164 = arith.addf %155, %163 : vector<8x128xf32>
    %165 = arith.addf %164, %65 : vector<8x128xf32>
    %c1_i32 = arith.constant 1 : i32
    %cst_72 = arith.constant dense<0.000000e+00> : vector<8x128xf32>
    %166 = tpu.matmul %165, %0, %cst_72 {dimension_numbers = #tpu.dot_dimension_numbers<[1], [0], [0], [1], [0, 0, 1, 1], [], []>} : vector<8x128xf32>, vector<128x128xf32>, vector<8x128xf32> -> vector<8x128xf32>
    %167 = arith.addf %166, %2 : vector<8x128xf32>
    %cst_73 = arith.constant 5.000000e-01 : f32
    %168 = vector.broadcast %cst_73 : f32 to vector<8x128xf32>
    %169 = arith.mulf %167, %168 : vector<8x128xf32>
    %170 = math.tanh %169 : vector<8x128xf32>
    %cst_74 = arith.constant dense<0.000000e+00> : vector<8x128xf32>
    %171 = tpu.matmul %170, %1, %cst_74 {dimension_numbers = #tpu.dot_dimension_numbers<[1], [0], [0], [1], [0, 0, 1, 1], [], []>} : vector<8x128xf32>, vector<128x128xf32>, vector<8x128xf32> -> vector<8x128xf32>
    %cst_75 = arith.constant 0.000000e+00 : f32
    %172 = vector.broadcast %cst_75 : f32 to vector<8x128xf32>
    %173 = vector.broadcast %33 : f32 to vector<8x128xf32>
    %174 = arith.addf %172, %173 : vector<8x128xf32>
    %175 = vector.broadcast %3 : f32 to vector<8x128xf32>
    %176 = arith.mulf %175, %171 : vector<8x128xf32>
    %177 = vector.broadcast %13 : f32 to vector<8x128xf32>
    %178 = arith.addf %176, %177 : vector<8x128xf32>
    %cst_76 = arith.constant 0.000000e+00 : f32
    %179 = vector.broadcast %cst_76 : f32 to vector<8x128xf32>
    %180 = arith.maximumf %178, %179 : vector<8x128xf32>
    %181 = vector.broadcast %23 : f32 to vector<8x128xf32>
    %182 = arith.mulf %181, %180 : vector<8x128xf32>
    %183 = arith.addf %174, %182 : vector<8x128xf32>
    %184 = vector.broadcast %4 : f32 to vector<8x128xf32>
    %185 = arith.mulf %184, %171 : vector<8x128xf32>
    %186 = vector.broadcast %14 : f32 to vector<8x128xf32>
    %187 = arith.addf %185, %186 : vector<8x128xf32>
    %cst_77 = arith.constant 0.000000e+00 : f32
    %188 = vector.broadcast %cst_77 : f32 to vector<8x128xf32>
    %189 = arith.maximumf %187, %188 : vector<8x128xf32>
    %190 = vector.broadcast %24 : f32 to vector<8x128xf32>
    %191 = arith.mulf %190, %189 : vector<8x128xf32>
    %192 = arith.addf %183, %191 : vector<8x128xf32>
    %193 = vector.broadcast %5 : f32 to vector<8x128xf32>
    %194 = arith.mulf %193, %171 : vector<8x128xf32>
    %195 = vector.broadcast %15 : f32 to vector<8x128xf32>
    %196 = arith.addf %194, %195 : vector<8x128xf32>
    %cst_78 = arith.constant 0.000000e+00 : f32
    %197 = vector.broadcast %cst_78 : f32 to vector<8x128xf32>
    %198 = arith.maximumf %196, %197 : vector<8x128xf32>
    %199 = vector.broadcast %25 : f32 to vector<8x128xf32>
    %200 = arith.mulf %199, %198 : vector<8x128xf32>
    %201 = arith.addf %192, %200 : vector<8x128xf32>
    %202 = vector.broadcast %6 : f32 to vector<8x128xf32>
    %203 = arith.mulf %202, %171 : vector<8x128xf32>
    %204 = vector.broadcast %16 : f32 to vector<8x128xf32>
    %205 = arith.addf %203, %204 : vector<8x128xf32>
    %cst_79 = arith.constant 0.000000e+00 : f32
    %206 = vector.broadcast %cst_79 : f32 to vector<8x128xf32>
    %207 = arith.maximumf %205, %206 : vector<8x128xf32>
    %208 = vector.broadcast %26 : f32 to vector<8x128xf32>
    %209 = arith.mulf %208, %207 : vector<8x128xf32>
    %210 = arith.addf %201, %209 : vector<8x128xf32>
    %211 = vector.broadcast %7 : f32 to vector<8x128xf32>
    %212 = arith.mulf %211, %171 : vector<8x128xf32>
    %213 = vector.broadcast %17 : f32 to vector<8x128xf32>
    %214 = arith.addf %212, %213 : vector<8x128xf32>
    %cst_80 = arith.constant 0.000000e+00 : f32
    %215 = vector.broadcast %cst_80 : f32 to vector<8x128xf32>
    %216 = arith.maximumf %214, %215 : vector<8x128xf32>
    %217 = vector.broadcast %27 : f32 to vector<8x128xf32>
    %218 = arith.mulf %217, %216 : vector<8x128xf32>
    %219 = arith.addf %210, %218 : vector<8x128xf32>
    %220 = vector.broadcast %8 : f32 to vector<8x128xf32>
    %221 = arith.mulf %220, %171 : vector<8x128xf32>
    %222 = vector.broadcast %18 : f32 to vector<8x128xf32>
    %223 = arith.addf %221, %222 : vector<8x128xf32>
    %cst_81 = arith.constant 0.000000e+00 : f32
    %224 = vector.broadcast %cst_81 : f32 to vector<8x128xf32>
    %225 = arith.maximumf %223, %224 : vector<8x128xf32>
    %226 = vector.broadcast %28 : f32 to vector<8x128xf32>
    %227 = arith.mulf %226, %225 : vector<8x128xf32>
    %228 = arith.addf %219, %227 : vector<8x128xf32>
    %229 = vector.broadcast %9 : f32 to vector<8x128xf32>
    %230 = arith.mulf %229, %171 : vector<8x128xf32>
    %231 = vector.broadcast %19 : f32 to vector<8x128xf32>
    %232 = arith.addf %230, %231 : vector<8x128xf32>
    %cst_82 = arith.constant 0.000000e+00 : f32
    %233 = vector.broadcast %cst_82 : f32 to vector<8x128xf32>
    %234 = arith.maximumf %232, %233 : vector<8x128xf32>
    %235 = vector.broadcast %29 : f32 to vector<8x128xf32>
    %236 = arith.mulf %235, %234 : vector<8x128xf32>
    %237 = arith.addf %228, %236 : vector<8x128xf32>
    %238 = vector.broadcast %10 : f32 to vector<8x128xf32>
    %239 = arith.mulf %238, %171 : vector<8x128xf32>
    %240 = vector.broadcast %20 : f32 to vector<8x128xf32>
    %241 = arith.addf %239, %240 : vector<8x128xf32>
    %cst_83 = arith.constant 0.000000e+00 : f32
    %242 = vector.broadcast %cst_83 : f32 to vector<8x128xf32>
    %243 = arith.maximumf %241, %242 : vector<8x128xf32>
    %244 = vector.broadcast %30 : f32 to vector<8x128xf32>
    %245 = arith.mulf %244, %243 : vector<8x128xf32>
    %246 = arith.addf %237, %245 : vector<8x128xf32>
    %247 = vector.broadcast %11 : f32 to vector<8x128xf32>
    %248 = arith.mulf %247, %171 : vector<8x128xf32>
    %249 = vector.broadcast %21 : f32 to vector<8x128xf32>
    %250 = arith.addf %248, %249 : vector<8x128xf32>
    %cst_84 = arith.constant 0.000000e+00 : f32
    %251 = vector.broadcast %cst_84 : f32 to vector<8x128xf32>
    %252 = arith.maximumf %250, %251 : vector<8x128xf32>
    %253 = vector.broadcast %31 : f32 to vector<8x128xf32>
    %254 = arith.mulf %253, %252 : vector<8x128xf32>
    %255 = arith.addf %246, %254 : vector<8x128xf32>
    %256 = vector.broadcast %12 : f32 to vector<8x128xf32>
    %257 = arith.mulf %256, %171 : vector<8x128xf32>
    %258 = vector.broadcast %22 : f32 to vector<8x128xf32>
    %259 = arith.addf %257, %258 : vector<8x128xf32>
    %cst_85 = arith.constant 0.000000e+00 : f32
    %260 = vector.broadcast %cst_85 : f32 to vector<8x128xf32>
    %261 = arith.maximumf %259, %260 : vector<8x128xf32>
    %262 = vector.broadcast %32 : f32 to vector<8x128xf32>
    %263 = arith.mulf %262, %261 : vector<8x128xf32>
    %264 = arith.addf %255, %263 : vector<8x128xf32>
    %265 = arith.addf %264, %165 : vector<8x128xf32>
    %c2_i32 = arith.constant 2 : i32
    %cst_86 = arith.constant dense<0.000000e+00> : vector<8x128xf32>
    %266 = tpu.matmul %265, %0, %cst_86 {dimension_numbers = #tpu.dot_dimension_numbers<[1], [0], [0], [1], [0, 0, 1, 1], [], []>} : vector<8x128xf32>, vector<128x128xf32>, vector<8x128xf32> -> vector<8x128xf32>
    %267 = arith.addf %266, %2 : vector<8x128xf32>
    %cst_87 = arith.constant 5.000000e-01 : f32
    %268 = vector.broadcast %cst_87 : f32 to vector<8x128xf32>
    %269 = arith.mulf %267, %268 : vector<8x128xf32>
    %270 = math.tanh %269 : vector<8x128xf32>
    %cst_88 = arith.constant dense<0.000000e+00> : vector<8x128xf32>
    %271 = tpu.matmul %270, %1, %cst_88 {dimension_numbers = #tpu.dot_dimension_numbers<[1], [0], [0], [1], [0, 0, 1, 1], [], []>} : vector<8x128xf32>, vector<128x128xf32>, vector<8x128xf32> -> vector<8x128xf32>
    %cst_89 = arith.constant 0.000000e+00 : f32
    %272 = vector.broadcast %cst_89 : f32 to vector<8x128xf32>
    %273 = vector.broadcast %33 : f32 to vector<8x128xf32>
    %274 = arith.addf %272, %273 : vector<8x128xf32>
    %275 = vector.broadcast %3 : f32 to vector<8x128xf32>
    %276 = arith.mulf %275, %271 : vector<8x128xf32>
    %277 = vector.broadcast %13 : f32 to vector<8x128xf32>
    %278 = arith.addf %276, %277 : vector<8x128xf32>
    %cst_90 = arith.constant 0.000000e+00 : f32
    %279 = vector.broadcast %cst_90 : f32 to vector<8x128xf32>
    %280 = arith.maximumf %278, %279 : vector<8x128xf32>
    %281 = vector.broadcast %23 : f32 to vector<8x128xf32>
    %282 = arith.mulf %281, %280 : vector<8x128xf32>
    %283 = arith.addf %274, %282 : vector<8x128xf32>
    %284 = vector.broadcast %4 : f32 to vector<8x128xf32>
    %285 = arith.mulf %284, %271 : vector<8x128xf32>
    %286 = vector.broadcast %14 : f32 to vector<8x128xf32>
    %287 = arith.addf %285, %286 : vector<8x128xf32>
    %cst_91 = arith.constant 0.000000e+00 : f32
    %288 = vector.broadcast %cst_91 : f32 to vector<8x128xf32>
    %289 = arith.maximumf %287, %288 : vector<8x128xf32>
    %290 = vector.broadcast %24 : f32 to vector<8x128xf32>
    %291 = arith.mulf %290, %289 : vector<8x128xf32>
    %292 = arith.addf %283, %291 : vector<8x128xf32>
    %293 = vector.broadcast %5 : f32 to vector<8x128xf32>
    %294 = arith.mulf %293, %271 : vector<8x128xf32>
    %295 = vector.broadcast %15 : f32 to vector<8x128xf32>
    %296 = arith.addf %294, %295 : vector<8x128xf32>
    %cst_92 = arith.constant 0.000000e+00 : f32
    %297 = vector.broadcast %cst_92 : f32 to vector<8x128xf32>
    %298 = arith.maximumf %296, %297 : vector<8x128xf32>
    %299 = vector.broadcast %25 : f32 to vector<8x128xf32>
    %300 = arith.mulf %299, %298 : vector<8x128xf32>
    %301 = arith.addf %292, %300 : vector<8x128xf32>
    %302 = vector.broadcast %6 : f32 to vector<8x128xf32>
    %303 = arith.mulf %302, %271 : vector<8x128xf32>
    %304 = vector.broadcast %16 : f32 to vector<8x128xf32>
    %305 = arith.addf %303, %304 : vector<8x128xf32>
    %cst_93 = arith.constant 0.000000e+00 : f32
    %306 = vector.broadcast %cst_93 : f32 to vector<8x128xf32>
    %307 = arith.maximumf %305, %306 : vector<8x128xf32>
    %308 = vector.broadcast %26 : f32 to vector<8x128xf32>
    %309 = arith.mulf %308, %307 : vector<8x128xf32>
    %310 = arith.addf %301, %309 : vector<8x128xf32>
    %311 = vector.broadcast %7 : f32 to vector<8x128xf32>
    %312 = arith.mulf %311, %271 : vector<8x128xf32>
    %313 = vector.broadcast %17 : f32 to vector<8x128xf32>
    %314 = arith.addf %312, %313 : vector<8x128xf32>
    %cst_94 = arith.constant 0.000000e+00 : f32
    %315 = vector.broadcast %cst_94 : f32 to vector<8x128xf32>
    %316 = arith.maximumf %314, %315 : vector<8x128xf32>
    %317 = vector.broadcast %27 : f32 to vector<8x128xf32>
    %318 = arith.mulf %317, %316 : vector<8x128xf32>
    %319 = arith.addf %310, %318 : vector<8x128xf32>
    %320 = vector.broadcast %8 : f32 to vector<8x128xf32>
    %321 = arith.mulf %320, %271 : vector<8x128xf32>
    %322 = vector.broadcast %18 : f32 to vector<8x128xf32>
    %323 = arith.addf %321, %322 : vector<8x128xf32>
    %cst_95 = arith.constant 0.000000e+00 : f32
    %324 = vector.broadcast %cst_95 : f32 to vector<8x128xf32>
    %325 = arith.maximumf %323, %324 : vector<8x128xf32>
    %326 = vector.broadcast %28 : f32 to vector<8x128xf32>
    %327 = arith.mulf %326, %325 : vector<8x128xf32>
    %328 = arith.addf %319, %327 : vector<8x128xf32>
    %329 = vector.broadcast %9 : f32 to vector<8x128xf32>
    %330 = arith.mulf %329, %271 : vector<8x128xf32>
    %331 = vector.broadcast %19 : f32 to vector<8x128xf32>
    %332 = arith.addf %330, %331 : vector<8x128xf32>
    %cst_96 = arith.constant 0.000000e+00 : f32
    %333 = vector.broadcast %cst_96 : f32 to vector<8x128xf32>
    %334 = arith.maximumf %332, %333 : vector<8x128xf32>
    %335 = vector.broadcast %29 : f32 to vector<8x128xf32>
    %336 = arith.mulf %335, %334 : vector<8x128xf32>
    %337 = arith.addf %328, %336 : vector<8x128xf32>
    %338 = vector.broadcast %10 : f32 to vector<8x128xf32>
    %339 = arith.mulf %338, %271 : vector<8x128xf32>
    %340 = vector.broadcast %20 : f32 to vector<8x128xf32>
    %341 = arith.addf %339, %340 : vector<8x128xf32>
    %cst_97 = arith.constant 0.000000e+00 : f32
    %342 = vector.broadcast %cst_97 : f32 to vector<8x128xf32>
    %343 = arith.maximumf %341, %342 : vector<8x128xf32>
    %344 = vector.broadcast %30 : f32 to vector<8x128xf32>
    %345 = arith.mulf %344, %343 : vector<8x128xf32>
    %346 = arith.addf %337, %345 : vector<8x128xf32>
    %347 = vector.broadcast %11 : f32 to vector<8x128xf32>
    %348 = arith.mulf %347, %271 : vector<8x128xf32>
    %349 = vector.broadcast %21 : f32 to vector<8x128xf32>
    %350 = arith.addf %348, %349 : vector<8x128xf32>
    %cst_98 = arith.constant 0.000000e+00 : f32
    %351 = vector.broadcast %cst_98 : f32 to vector<8x128xf32>
    %352 = arith.maximumf %350, %351 : vector<8x128xf32>
    %353 = vector.broadcast %31 : f32 to vector<8x128xf32>
    %354 = arith.mulf %353, %352 : vector<8x128xf32>
    %355 = arith.addf %346, %354 : vector<8x128xf32>
    %356 = vector.broadcast %12 : f32 to vector<8x128xf32>
    %357 = arith.mulf %356, %271 : vector<8x128xf32>
    %358 = vector.broadcast %22 : f32 to vector<8x128xf32>
    %359 = arith.addf %357, %358 : vector<8x128xf32>
    %cst_99 = arith.constant 0.000000e+00 : f32
    %360 = vector.broadcast %cst_99 : f32 to vector<8x128xf32>
    %361 = arith.maximumf %359, %360 : vector<8x128xf32>
    %362 = vector.broadcast %32 : f32 to vector<8x128xf32>
    %363 = arith.mulf %362, %361 : vector<8x128xf32>
    %364 = arith.addf %355, %363 : vector<8x128xf32>
    %365 = arith.addf %364, %265 : vector<8x128xf32>
    %c0_100 = arith.constant 0 : index
    %c0_101 = arith.constant 0 : index
    %366 = vector.load %arg4[%c0_100, %c0_101] : memref<1x128xf32, #tpu.memory_space<vmem>>, vector<1x128xf32>
    %367 = vector.broadcast %366 : vector<1x128xf32> to vector<8x128xf32>
    %368 = arith.mulf %365, %367 : vector<8x128xf32>
    %c0_102 = arith.constant 0 : index
    %c0_103 = arith.constant 0 : index
    %369 = vector.load %arg3[%c0_102, %c0_103] : memref<128x128xf32, #tpu.memory_space<vmem>>, vector<128x128xf32>
    %cst_104 = arith.constant dense<0.000000e+00> : vector<8x128xf32>
    %370 = tpu.matmul %368, %369, %cst_104 {dimension_numbers = #tpu.dot_dimension_numbers<[1], [0], [0], [1], [0, 0, 1, 1], [], []>} : vector<8x128xf32>, vector<128x128xf32>, vector<8x128xf32> -> vector<8x128xf32>
    %c0_105 = arith.constant 0 : index
    %c0_106 = arith.constant 0 : index
    %371 = vector.load %arg6[%c0_105, %c0_106] : memref<8x128xf32, #tpu.memory_space<vmem>>, vector<8x128xf32>
    %372 = arith.addf %370, %371 : vector<8x128xf32>
    %cst_107 = arith.constant 0.000000e+00 : f32
    %373 = vector.broadcast %cst_107 : f32 to vector<8x128xf32>
    %374 = vector.broadcast %64 : f32 to vector<8x128xf32>
    %375 = arith.addf %373, %374 : vector<8x128xf32>
    %376 = vector.broadcast %34 : f32 to vector<8x128xf32>
    %377 = arith.mulf %376, %372 : vector<8x128xf32>
    %378 = vector.broadcast %44 : f32 to vector<8x128xf32>
    %379 = arith.addf %377, %378 : vector<8x128xf32>
    %cst_108 = arith.constant 0.000000e+00 : f32
    %380 = vector.broadcast %cst_108 : f32 to vector<8x128xf32>
    %381 = arith.maximumf %379, %380 : vector<8x128xf32>
    %382 = vector.broadcast %54 : f32 to vector<8x128xf32>
    %383 = arith.mulf %382, %381 : vector<8x128xf32>
    %384 = arith.addf %375, %383 : vector<8x128xf32>
    %385 = vector.broadcast %35 : f32 to vector<8x128xf32>
    %386 = arith.mulf %385, %372 : vector<8x128xf32>
    %387 = vector.broadcast %45 : f32 to vector<8x128xf32>
    %388 = arith.addf %386, %387 : vector<8x128xf32>
    %cst_109 = arith.constant 0.000000e+00 : f32
    %389 = vector.broadcast %cst_109 : f32 to vector<8x128xf32>
    %390 = arith.maximumf %388, %389 : vector<8x128xf32>
    %391 = vector.broadcast %55 : f32 to vector<8x128xf32>
    %392 = arith.mulf %391, %390 : vector<8x128xf32>
    %393 = arith.addf %384, %392 : vector<8x128xf32>
    %394 = vector.broadcast %36 : f32 to vector<8x128xf32>
    %395 = arith.mulf %394, %372 : vector<8x128xf32>
    %396 = vector.broadcast %46 : f32 to vector<8x128xf32>
    %397 = arith.addf %395, %396 : vector<8x128xf32>
    %cst_110 = arith.constant 0.000000e+00 : f32
    %398 = vector.broadcast %cst_110 : f32 to vector<8x128xf32>
    %399 = arith.maximumf %397, %398 : vector<8x128xf32>
    %400 = vector.broadcast %56 : f32 to vector<8x128xf32>
    %401 = arith.mulf %400, %399 : vector<8x128xf32>
    %402 = arith.addf %393, %401 : vector<8x128xf32>
    %403 = vector.broadcast %37 : f32 to vector<8x128xf32>
    %404 = arith.mulf %403, %372 : vector<8x128xf32>
    %405 = vector.broadcast %47 : f32 to vector<8x128xf32>
    %406 = arith.addf %404, %405 : vector<8x128xf32>
    %cst_111 = arith.constant 0.000000e+00 : f32
    %407 = vector.broadcast %cst_111 : f32 to vector<8x128xf32>
    %408 = arith.maximumf %406, %407 : vector<8x128xf32>
    %409 = vector.broadcast %57 : f32 to vector<8x128xf32>
    %410 = arith.mulf %409, %408 : vector<8x128xf32>
    %411 = arith.addf %402, %410 : vector<8x128xf32>
    %412 = vector.broadcast %38 : f32 to vector<8x128xf32>
    %413 = arith.mulf %412, %372 : vector<8x128xf32>
    %414 = vector.broadcast %48 : f32 to vector<8x128xf32>
    %415 = arith.addf %413, %414 : vector<8x128xf32>
    %cst_112 = arith.constant 0.000000e+00 : f32
    %416 = vector.broadcast %cst_112 : f32 to vector<8x128xf32>
    %417 = arith.maximumf %415, %416 : vector<8x128xf32>
    %418 = vector.broadcast %58 : f32 to vector<8x128xf32>
    %419 = arith.mulf %418, %417 : vector<8x128xf32>
    %420 = arith.addf %411, %419 : vector<8x128xf32>
    %421 = vector.broadcast %39 : f32 to vector<8x128xf32>
    %422 = arith.mulf %421, %372 : vector<8x128xf32>
    %423 = vector.broadcast %49 : f32 to vector<8x128xf32>
    %424 = arith.addf %422, %423 : vector<8x128xf32>
    %cst_113 = arith.constant 0.000000e+00 : f32
    %425 = vector.broadcast %cst_113 : f32 to vector<8x128xf32>
    %426 = arith.maximumf %424, %425 : vector<8x128xf32>
    %427 = vector.broadcast %59 : f32 to vector<8x128xf32>
    %428 = arith.mulf %427, %426 : vector<8x128xf32>
    %429 = arith.addf %420, %428 : vector<8x128xf32>
    %430 = vector.broadcast %40 : f32 to vector<8x128xf32>
    %431 = arith.mulf %430, %372 : vector<8x128xf32>
    %432 = vector.broadcast %50 : f32 to vector<8x128xf32>
    %433 = arith.addf %431, %432 : vector<8x128xf32>
    %cst_114 = arith.constant 0.000000e+00 : f32
    %434 = vector.broadcast %cst_114 : f32 to vector<8x128xf32>
    %435 = arith.maximumf %433, %434 : vector<8x128xf32>
    %436 = vector.broadcast %60 : f32 to vector<8x128xf32>
    %437 = arith.mulf %436, %435 : vector<8x128xf32>
    %438 = arith.addf %429, %437 : vector<8x128xf32>
    %439 = vector.broadcast %41 : f32 to vector<8x128xf32>
    %440 = arith.mulf %439, %372 : vector<8x128xf32>
    %441 = vector.broadcast %51 : f32 to vector<8x128xf32>
    %442 = arith.addf %440, %441 : vector<8x128xf32>
    %cst_115 = arith.constant 0.000000e+00 : f32
    %443 = vector.broadcast %cst_115 : f32 to vector<8x128xf32>
    %444 = arith.maximumf %442, %443 : vector<8x128xf32>
    %445 = vector.broadcast %61 : f32 to vector<8x128xf32>
    %446 = arith.mulf %445, %444 : vector<8x128xf32>
    %447 = arith.addf %438, %446 : vector<8x128xf32>
    %448 = vector.broadcast %42 : f32 to vector<8x128xf32>
    %449 = arith.mulf %448, %372 : vector<8x128xf32>
    %450 = vector.broadcast %52 : f32 to vector<8x128xf32>
    %451 = arith.addf %449, %450 : vector<8x128xf32>
    %cst_116 = arith.constant 0.000000e+00 : f32
    %452 = vector.broadcast %cst_116 : f32 to vector<8x128xf32>
    %453 = arith.maximumf %451, %452 : vector<8x128xf32>
    %454 = vector.broadcast %62 : f32 to vector<8x128xf32>
    %455 = arith.mulf %454, %453 : vector<8x128xf32>
    %456 = arith.addf %447, %455 : vector<8x128xf32>
    %457 = vector.broadcast %43 : f32 to vector<8x128xf32>
    %458 = arith.mulf %457, %372 : vector<8x128xf32>
    %459 = vector.broadcast %53 : f32 to vector<8x128xf32>
    %460 = arith.addf %458, %459 : vector<8x128xf32>
    %cst_117 = arith.constant 0.000000e+00 : f32
    %461 = vector.broadcast %cst_117 : f32 to vector<8x128xf32>
    %462 = arith.maximumf %460, %461 : vector<8x128xf32>
    %463 = vector.broadcast %63 : f32 to vector<8x128xf32>
    %464 = arith.mulf %463, %462 : vector<8x128xf32>
    %465 = arith.addf %456, %464 : vector<8x128xf32>
    %466 = math.exp %465 : vector<8x128xf32>
    %cst_118 = arith.constant 1.000000e+00 : f32
    %467 = vector.broadcast %cst_118 : f32 to vector<8x128xf32>
    %468 = arith.addf %467, %466 : vector<8x128xf32>
    %cst_119 = arith.constant 1.000000e+00 : f32
    %469 = vector.broadcast %cst_119 : f32 to vector<8x128xf32>
    %470 = arith.divf %469, %468 : vector<8x128xf32>
    %cst_120 = arith.constant 1.000000e-07 : f32
    %cst_121 = arith.constant 0.99999988 : f32
    %471 = vector.broadcast %cst_120 : f32 to vector<8x128xf32>
    %472 = arith.maximumf %471, %470 : vector<8x128xf32>
    %473 = vector.broadcast %cst_121 : f32 to vector<8x128xf32>
    %474 = arith.minimumf %473, %472 : vector<8x128xf32>
    %c0_122 = arith.constant 0 : index
    %c0_123 = arith.constant 0 : index
    %475 = vector.load %arg15[%c0_122, %c0_123] : memref<8x128xf32, #tpu.memory_space<vmem>>, vector<8x128xf32>
    tpu.vector_store %arg15[%c0_122, %c0_123], %474 {strides = array<i32>} : memref<8x128xf32, #tpu.memory_space<vmem>>, vector<8x128xf32>,
    return
  }
  func.func @transform_0(%arg0: i32) -> (i32, i32) {
    %c0_i32 = arith.constant 0 : i32
    %c0_i32_0 = arith.constant 0 : i32
    %c0_i32_1 = arith.constant 0 : i32
    return %c0_i32, %c0_i32_0 : i32, i32
  }
  func.func @transform_1(%arg0: i32) -> (i32, i32) {
    %c0_i32 = arith.constant 0 : i32
    %c0_i32_0 = arith.constant 0 : i32
    %c0_i32_1 = arith.constant 0 : i32
    return %c0_i32, %c0_i32_0 : i32, i32
  }
  func.func @transform_2(%arg0: i32) -> (i32, i32) {
    %c0_i32 = arith.constant 0 : i32
    %c0_i32_0 = arith.constant 0 : i32
    %c0_i32_1 = arith.constant 0 : i32
    return %c0_i32, %c0_i32_0 : i32, i32
  }
  func.func @transform_3(%arg0: i32) -> (i32, i32) {
    %c0_i32 = arith.constant 0 : i32
    %c0_i32_0 = arith.constant 0 : i32
    %c0_i32_1 = arith.constant 0 : i32
    return %c0_i32, %c0_i32_0 : i32, i32
  }
  func.func @transform_4(%arg0: i32) -> (i32, i32) {
    %c0_i32 = arith.constant 0 : i32
    %c0_i32_0 = arith.constant 0 : i32
    return %arg0, %c0_i32 : i32, i32
  }
  func.func @transform_5(%arg0: i32) -> (i32, i32) {
    %c0_i32 = arith.constant 0 : i32
    %c0_i32_0 = arith.constant 0 : i32
    return %arg0, %c0_i32 : i32, i32
  }
  func.func @transform_6(%arg0: i32) -> i32 {
    %c0_i32 = arith.constant 0 : i32
    %c0_i32_0 = arith.constant 0 : i32
    return %c0_i32 : i32
  }
  func.func @transform_7(%arg0: i32) -> i32 {
    %c0_i32 = arith.constant 0 : i32
    %c0_i32_0 = arith.constant 0 : i32
    return %c0_i32 : i32
  }
  func.func @transform_8(%arg0: i32) -> i32 {
    %c0_i32 = arith.constant 0 : i32
    %c0_i32_0 = arith.constant 0 : i32
    return %c0_i32 : i32
  }
  func.func @transform_9(%arg0: i32) -> i32 {
    %c0_i32 = arith.constant 0 : i32
    %c0_i32_0 = arith.constant 0 : i32
    return %c0_i32 : i32
  }
  func.func @transform_10(%arg0: i32) -> i32 {
    %c0_i32 = arith.constant 0 : i32
    %c0_i32_0 = arith.constant 0 : i32
    return %c0_i32 : i32
  }
  func.func @transform_11(%arg0: i32) -> i32 {
    %c0_i32 = arith.constant 0 : i32
    %c0_i32_0 = arith.constant 0 : i32
    return %c0_i32 : i32
  }
  func.func @transform_12(%arg0: i32) -> i32 {
    %c0_i32 = arith.constant 0 : i32
    %c0_i32_0 = arith.constant 0 : i32
    return %c0_i32 : i32
  }
  func.func @transform_13(%arg0: i32) -> i32 {
    %c0_i32 = arith.constant 0 : i32
    %c0_i32_0 = arith.constant 0 : i32
    return %c0_i32 : i32
  }
  func.func @transform_14(%arg0: i32) -> (i32, i32) {
    %c0_i32 = arith.constant 0 : i32
    %c0_i32_0 = arith.constant 0 : i32
    return %arg0, %c0_i32 : i32, i32
  }
}

</mosaic_0001>

<bundles_post_ra>
// kernel: forward.1
= control target key start
LH: loop header
LB: loop body
LE: loop exit
PB: predicated region body
PF: predicated region fallthrough
CT: control target
= control target key end

     0   :  { %21 = vsyncpa [#allocation5], 0  ;;  %s1472_s0 = inlined_call_operand.vmem [shape: f32[128,128], index: 0, kind: input, shape index: {}]   ;;  %s1473_s1 = inlined_call_operand.vmem [shape: f32[128,128], index: 1, kind: input, shape index: {}]   ;;  %s1474_s2 = inlined_call_operand.vmem [shape: f32[128,128], index: 2, kind: input, shape index: {}]   ;;  %s1475_s3 = inlined_call_operand.vmem [shape: f32[1,128], index: 3, kind: input, shape index: {}]   ;;  %s1476_s4 = inlined_call_operand.vmem [shape: f32[8,128], index: 4, kind: input, shape index: {}]   ;;  %s1477_s5 = inlined_call_operand.vmem [shape: f32[8,128], index: 5, kind: input, shape index: {}]   ;;  %s1478_s6 = inlined_call_operand.vmem [shape: f32[10], index: 6, kind: input, shape index: {}]   ;;  %s1479_s7 = inlined_call_operand.vmem [shape: f32[10], index: 7, kind: input, shape index: {}]   ;;  %s1480_s8 = inlined_call_operand.vmem [shape: f32[10], index: 8, kind: input, shape index: {}]   ;;  %s1481_s9 = inlined_call_operand.<no memory space> [shape: f32[1], index: 9, kind: input, shape index: {}]   ;;  %s1482_s10 = inlined_call_operand.vmem [shape: f32[10], index: 10, kind: input, shape index: {}]   ;;  %s1483_s11 = inlined_call_operand.vmem [shape: f32[10], index: 11, kind: input, shape index: {}]   ;;  %s1484_s12 = inlined_call_operand.vmem [shape: f32[10], index: 12, kind: input, shape index: {}]   ;;  %s1485_s13 = inlined_call_operand.<no memory space> [shape: f32[1], index: 13, kind: input, shape index: {}]   ;;  %s1486_s14 = inlined_call_operand.vmem [shape: f32[8,128], index: 14, kind: output, shape index: {}]  }
   0x1   :  { %22 = vsyncpa [#allocation7], 0 }
   0x2   :  { %23 = vsyncpa [#allocation10], 0  ;;  %s51_s15 = sshll.u32 %s1479_s7, 4  ;;  %s52_s15 = int_to_ptr.vmem [resolvable:$true] %s51_s15 }
   0x3   :  { %24 = vsyncpa [#allocation13], 0  ;;  %s71_s18 = sshll.u32 %s1482_s10, 4  ;;  %s831_s19 = smov [#allocation6]   ;;  %s72_s18 = int_to_ptr.vmem [resolvable:$true] %s71_s18 }
   0x4   :  { %54 = dma.vmem_to_smem %s52_s15, 16, %s831_s19, [#allocation7]  }
   0x5   :  { %s832_s20 = smov [#allocation9]   ;;  %s42_s23 = sshll.u32 %s1478_s6, 4  ;;  %s43_s23 = int_to_ptr.vmem [resolvable:$true] %s42_s23 }
   0x6   :  { %74 = dma.vmem_to_smem %s72_s18, 16, %s832_s20, [#allocation10]  }
   0x7   :  { %s60_s7 = sshll.u32 %s1480_s8, 4  ;;  %s833_s26 = smov [#allocation4]   ;;  %s61_s7 = int_to_ptr.vmem [resolvable:$true] %s60_s7 }
   0x8   :  { %45 = dma.vmem_to_smem %s43_s23, 16, %s833_s26, [#allocation5]  }
   0x9   :  { %s834_s27 = smov [#allocation8]   ;;  %s80_s29 = sshll.u32 %s1483_s11, 4  ;;  %s81_s29 = int_to_ptr.vmem [resolvable:$true] %s80_s29 }
   0xa   :  { %63 = dma.vmem_to_smem %s61_s7, 16, %s834_s27, [#allocation7]  }
   0xb   :  { %s89_s16 = sshll.u32 %s1484_s12, 4  ;;  %s835_s6 = smov [#allocation11]   ;;  %s90_s16 = int_to_ptr.vmem [resolvable:$true] %s89_s16 }
   0xc   :  { %83 = dma.vmem_to_smem %s81_s29, 16, %s835_s6, [#allocation10]  }
   0xd   :  { %s836_s17 = smov [#allocation12]  }
   0xe   :  { %92 = dma.vmem_to_smem %s90_s16, 16, %s836_s17, [#allocation13]  }
   0xf   :  { %823 = dma.done.wait [#allocation5], 16  }
  0x10   :  { %824 = vsyncadd [#allocation5], 4294967280 }
  0x11   :  { %825 = dma.done.wait [#allocation7], 32  }
  0x12   :  { %826 = vsyncadd [#allocation7], 4294967264 }
  0x13   :  { %827 = dma.done.wait [#allocation10], 32  }
  0x14   :  { %828 = vsyncadd [#allocation10], 4294967264 }
  0x15   :  { %829 = dma.done.wait [#allocation13], 16  }
  0x16   :  { %830 = vsyncadd [#allocation13], 4294967280 }
  0x17   :  { %119 = sfence }
  0x18   :  { %v934_v0 = vld [vmem:[%s1472_s0 + $0x78] sm:$0xff]  ;;  %v939_v1 = vld [vmem:[%s1472_s0 + $0x70] sm:$0xff]  ;;  %v946_v2 = vld [vmem:[%s1472_s0 + $0x68] sm:$0xff]  ;;  %v837_v26 = vmov 0.0   ;;  %s153_s6 = sld [smem:[#allocation4]] }
  0x19   :  { %215 = vmatpush.msra.mxu0 %v934_v0  ;;  %340 = vmatpush.msra.mxu2 %v934_v0  ;;  %v953_v3 = vld [vmem:[%s1472_s0 + $0x60] sm:$0xff]  ;;  %v959_v4 = vld [vmem:[%s1473_s1 + $0x78] sm:$0xff]  ;;  %v964_v5 = vld [vmem:[%s1473_s1 + $0x70] sm:$0xff]  ;;  %s679_s17 = sld [smem:[#allocation4 + $0x1]] }
  0x1a   :  { %v970_v6 = vld [vmem:[%s1472_s0 + $0x58] sm:$0xff]  ;;  %237 = vmatpush.msra.mxu1 %v959_v4  ;;  %362 = vmatpush.msra.mxu3 %v959_v4  ;;  %v978_v7 = vld [vmem:[%s1473_s1 + $0x68] sm:$0xff]  ;;  %v984_v8 = vld [vmem:[%s1472_s0 + $0x50] sm:$0xff]  ;;  %s680_s8 = sld [smem:[#allocation4 + $0x2]] }
  0x1b   :  { %216 = vmatpush.msra.mxu0 %v939_v1  ;;  %341 = vmatpush.msra.mxu2 %v939_v1  ;;  %v992_v9 = vld [vmem:[%s1473_s1 + $0x60] sm:$0xff]  ;;  %v129_v10 = vld [vmem:[%s1472_s0 + $0x48] sm:$0xff]  ;;  %v1004_v11 = vld [vmem:[%s1473_s1 + $0x58] sm:$0xff]  ;;  %s682_s11 = sld [smem:[#allocation4 + $0x4]] }
  0x1c   :  { %238 = vmatpush.msra.mxu1 %v964_v5  ;;  %363 = vmatpush.msra.mxu3 %v964_v5  ;;  %v128_v12 = vld [vmem:[%s1472_s0 + $0x40] sm:$0xff]  ;;  %v1015_v13 = vld [vmem:[%s1473_s1 + $0x50] sm:$0xff]  ;;  %v127_v14 = vld [vmem:[%s1472_s0 + $0x38] sm:$0xff]  ;;  %s1113_s12 = sld [smem:[#allocation4 + $0x5]] }
  0x1d   :  { %217 = vmatpush.msra.mxu0 %v946_v2  ;;  %342 = vmatpush.msra.mxu2 %v946_v2  ;;  %v1025_v15 = vld [vmem:[%s1473_s1 + $0x48] sm:$0xff]  ;;  %v126_v16 = vld [vmem:[%s1472_s0 + $0x30] sm:$0xff]  ;;  %v1035_v17 = vld [vmem:[%s1473_s1 + $0x40] sm:$0xff]  ;;  %s1115_s18 = sld [smem:[#allocation4 + $0x6]] }
  0x1e   :  { %239 = vmatpush.msra.mxu1 %v978_v7  ;;  %364 = vmatpush.msra.mxu3 %v978_v7  ;;  %v125_v18 = vld [vmem:[%s1472_s0 + $0x28] sm:$0xff]  ;;  %v1045_v19 = vld [vmem:[%s1473_s1 + $0x38] sm:$0xff]  ;;  %v124_v20 = vld [vmem:[%s1472_s0 + $0x20] sm:$0xff]  ;;  %s1117_s19 = sld [smem:[#allocation4 + $0x7]]  ;;  %v1129_v38 = vstv %s153_s6 }
  0x1f   :  { %218 = vmatpush.msra.mxu0 %v953_v3  ;;  %343 = vmatpush.msra.mxu2 %v953_v3  ;;  %v1055_v21 = vld [vmem:[%s1473_s1 + $0x30] sm:$0xff]  ;;  %v123_v22 = vld [vmem:[%s1472_s0 + $0x18] sm:$0xff]  ;;  %v121_v24 = vld [vmem:[%s1472_s0 + $0x8] sm:$0xff]  ;;  %s1119_s20 = sld [smem:[#allocation4 + $0x8]]  ;;  %v1131_v39 = vstv %s679_s17 }
  0x20   :  { %240 = vmatpush.msra.mxu1 %v992_v9  ;;  %365 = vmatpush.msra.mxu3 %v992_v9  ;;  %v122_v23 = vld [vmem:[%s1472_s0 + $0x10] sm:$0xff]  ;;  %v120_v25 = vld [vmem:[%s1472_s0] sm:$0xff]  ;;  %v141_v27 = vld [vmem:[%s1473_s1 + $0x28] sm:$0xff]  ;;  %s163_s21 = sld [smem:[#allocation6]]  ;;  %v1133_v40 = vstv %s680_s8 }
  0x21   :  { %219 = vmatpush.msra.mxu0 %v970_v6  ;;  %344 = vmatpush.msra.mxu2 %v970_v6  ;;  %v140_v28 = vld [vmem:[%s1473_s1 + $0x20] sm:$0xff]  ;;  %v139_v29 = vld [vmem:[%s1473_s1 + $0x18] sm:$0xff]  ;;  %v138_v30 = vld [vmem:[%s1473_s1 + $0x10] sm:$0xff]  ;;  %s688_s22 = sld [smem:[#allocation6 + $0x1]]  ;;  %v1147_v46 = vstv %s682_s11 }
  0x22   :  { %241 = vmatpush.msra.mxu1 %v1004_v11  ;;  %366 = vmatpush.msra.mxu3 %v1004_v11  ;;  %v137_v31 = vld [vmem:[%s1473_s1 + $0x8] sm:$0xff]  ;;  %v136_v32 = vld [vmem:[%s1473_s1] sm:$0xff]  ;;  %s689_s0 = sld [smem:[#allocation6 + $0x2]]  ;;  %v1160_v52 = vstv %s1113_s12 }
  0x23   :  { %220 = vmatpush.msra.mxu0 %v984_v8  ;;  %345 = vmatpush.msra.mxu2 %v984_v8  ;;  %v1109_v33 = vld [vmem:[%s1476_s4] sm:$0xff]  ;;  %s681_s4 = sld [smem:[#allocation4 + $0x3]]  ;;  %v1163_v53 = vstv %s1115_s18 }
  0x24   :  { %242 = vmatpush.msra.mxu1 %v1015_v13  ;;  %367 = vmatpush.msra.mxu3 %v1015_v13  ;;  %s690_s23 = sld [smem:[#allocation6 + $0x3]]  ;;  %v1179_v60 = vstv %s1117_s19 }
  0x25   :  { %221 = vmatpush.msra.mxu0 %v129_v10  ;;  %346 = vmatpush.msra.mxu2 %v129_v10  ;;  %s1121_s24 = sld [smem:[#allocation6 + $0x4]] }
  0x26   :  { %243 = vmatpush.msra.mxu1 %v1025_v15  ;;  %368 = vmatpush.msra.mxu3 %v1025_v15  ;;  %s1123_s25 = sld [smem:[#allocation6 + $0x5]]  ;;  %v1141_v43 = vstv %s163_s21 }
  0x27   :  { %222 = vmatpush.msra.mxu0 %v128_v12  ;;  %347 = vmatpush.msra.mxu2 %v128_v12  ;;  %s173_s7 = sld [smem:[#allocation8]]  ;;  %v1143_v44 = vstv %s688_s22 }
  0x28   :  { %244 = vmatpush.msra.mxu1 %v1035_v17  ;;  %369 = vmatpush.msra.mxu3 %v1035_v17  ;;  %s1125_s26 = sld [smem:[#allocation6 + $0x6]]  ;;  %v1145_v45 = vstv %s689_s0 }
  0x29   :  { %223 = vmatpush.msra.mxu0 %v127_v14  ;;  %348 = vmatpush.msra.mxu2 %v127_v14  ;;  %s1127_s27 = sld [smem:[#allocation8 + $0x1]]  ;;  %v1135_v41 = vstv %s681_s4 }
  0x2a   :  { %245 = vmatpush.msra.mxu1 %v1045_v19  ;;  %370 = vmatpush.msra.mxu3 %v1045_v19  ;;  %s1137_s10 = sld [smem:[#allocation6 + $0x7]]  ;;  %v1157_v51 = vstv %s690_s23 }
  0x2b   :  { %224 = vmatpush.msra.mxu0 %v126_v16  ;;  %349 = vmatpush.msra.mxu2 %v126_v16  ;;  %s1139_s28 = sld [smem:[#allocation8 + $0x2]]  ;;  %v1176_v59 = vstv %s1121_s24 }
  0x2c   :  { %246 = vmatpush.msra.mxu1 %v1055_v21  ;;  %371 = vmatpush.msra.mxu3 %v1055_v21  ;;  %s1149_s29 = sld [smem:[#allocation4 + $0x9]] }
  0x2d   :  { %225 = vmatpush.msra.mxu0 %v125_v18  ;;  %350 = vmatpush.msra.mxu2 %v125_v18  ;;  %s1155_s30 = sld [smem:[#allocation8 + $0x3]]  ;;  %v1173_v58 = vstv %s173_s7 }
  0x2e   :  { %247 = vmatpush.msra.mxu1 %v141_v27  ;;  %372 = vmatpush.msra.mxu3 %v141_v27  ;;  %s1165_s15 = sld [smem:[#allocation6 + $0x8]] }
  0x2f   :  { %226 = vmatpush.msra.mxu0 %v124_v20  ;;  %351 = vmatpush.msra.mxu2 %v124_v20  ;;  %s1171_s1 = sld [smem:[#allocation8 + $0x4]] }
  0x30   :  { %248 = vmatpush.msra.mxu1 %v140_v28  ;;  %373 = vmatpush.msra.mxu3 %v140_v28  ;;  %s1181_s16 = sld [smem:[#allocation6 + $0x9]] }
  0x31   :  { %227 = vmatpush.msra.mxu0 %v123_v22  ;;  %352 = vmatpush.msra.mxu2 %v123_v22  ;;  %s1185_s6 = sld [smem:[#allocation8 + $0x5]] }
  0x32   :  { %249 = vmatpush.msra.mxu1 %v139_v29  ;;  %374 = vmatpush.msra.mxu3 %v139_v29  ;;  %s1204_s4 = sld [smem:[#allocation8 + $0x6]] }
  0x33   :  { %228 = vmatpush.msra.mxu0 %v122_v23  ;;  %353 = vmatpush.msra.mxu2 %v122_v23  ;;  %s704_s11 = sld [smem:[#allocation8 + $0x8]] }
  0x34   :  { %250 = vmatpush.msra.mxu1 %v138_v30  ;;  %375 = vmatpush.msra.mxu3 %v138_v30  ;;  %s705_s12 = sld [smem:[#allocation8 + $0x9]] }
  0x35   :  { %229 = vmatpush.msra.mxu0 %v121_v24  ;;  %354 = vmatpush.msra.mxu2 %v121_v24  ;;  %s1379_s24 = sld [smem:[#allocation9]] }
  0x36   :  { %251 = vmatpush.msra.mxu1 %v137_v31  ;;  %376 = vmatpush.msra.mxu3 %v137_v31  ;;  %s1383_s7 = sld [smem:[#allocation9 + $0x2]] }
  0x37   :  { %230 = vmatpush.msra.mxu0 %v120_v25  ;;  %355 = vmatpush.msra.mxu2 %v120_v25  ;;  %s1407_s17 = sld [smem:[#allocation11 + $0x5]] }
  0x38   :  { %231 = vmatmul.f32.vlgmr.msra.gmra.mxu0 %v837_v26  ;;  %252 = vmatpush.msra.mxu1 %v136_v32  ;;  %v1233_v26 = vstv %s1165_s15  ;;  %s1399_s15 = sld [smem:[#allocation11 + $0x1]] }
  0x39   :  { %433 = vmatpush.msrb.mxu0 %v934_v0  ;;  %377 = vmatpush.msra.mxu3 %v136_v32  ;;  %s1409_s8 = sld [smem:[#allocation12]] }
  0x3a   :  { %455 = vmatpush.msrb.mxu1 %v959_v4  ;;  %s1422_s18 = sld [smem:[#allocation11 + $0x7]] }
  0x3b   :  { %434 = vmatpush.msrb.mxu0 %v939_v1  ;;  %v1190_v1 = vstv %s1481_s9  ;;  %s703_s9 = sld [smem:[#allocation8 + $0x7]] }
  0x3c   :  { %456 = vmatpush.msrb.mxu1 %v964_v5  ;;  %s1424_s19 = sld [smem:[#allocation12 + $0x2]] }
  0x3d   :  { %435 = vmatpush.msrb.mxu0 %v946_v2  ;;  %v1193_v2 = vstv %s1127_s27  ;;  %s1387_s27 = sld [smem:[#allocation9 + $0x4]] }
  0x3e   :  { %457 = vmatpush.msrb.mxu1 %v978_v7  ;;  %s1437_s21 = sld [smem:[#allocation11 + $0x8]] }
  0x3f   :  { %436 = vmatpush.msrb.mxu0 %v953_v3  ;;  %v1196_v3 = vstv %s1123_s25  ;;  %s1381_s25 = sld [smem:[#allocation9 + $0x1]] }
  0x40   :  { %458 = vmatpush.msrb.mxu1 %v992_v9  ;;  %v1207_v9 = vstv %s1139_s28  ;;  %s1391_s28 = sld [smem:[#allocation9 + $0x6]] }
  0x41   :  { %437 = vmatpush.msrb.mxu0 %v970_v6  ;;  %s1439_s22 = sld [smem:[#allocation12 + $0x4]] }
  0x42   :  { %459 = vmatpush.msrb.mxu1 %v1004_v11  ;;  %v1211_v11 = vstv %s1137_s10  ;;  %s1389_s10 = sld [smem:[#allocation9 + $0x5]] }
  0x43   :  { %438 = vmatpush.msrb.mxu0 %v984_v8  ;;  %v1202_v8 = vstv %s1125_s26  ;;  %s1385_s26 = sld [smem:[#allocation9 + $0x3]] }
  0x44   :  { %460 = vmatpush.msrb.mxu1 %v1015_v13  ;;  %s1444_s0 = sld [smem:[#allocation11 + $0x9]] }
  0x45   :  { %439 = vmatpush.msrb.mxu0 %v129_v10 }
  0x46   :  { %461 = vmatpush.msrb.mxu1 %v1025_v15 }
  0x47   :  { %440 = vmatpush.msrb.mxu0 %v128_v12  ;;  %v1214_v12 = vstv %s1119_s20  ;;  %s1432_s20 = sld [smem:[#allocation12 + $0x3]] }
  0x48   :  { %462 = vmatpush.msrb.mxu1 %v1035_v17  ;;  %v1220_v17 = vstv %s1155_s30  ;;  %s1397_s30 = sld [smem:[#allocation11]] }
  0x49   :  { %441 = vmatpush.msrb.mxu0 %v127_v14 }
  0x4a   :  { %463 = vmatpush.msrb.mxu1 %v1045_v19  ;;  %v1224_v19 = vstv %s1149_s29  ;;  %s1395_s29 = sld [smem:[#allocation9 + $0x8]] }
  0x4b   :  { %442 = vmatpush.msrb.mxu0 %v126_v16 }
  0x4c   :  { %464 = vmatpush.msrb.mxu1 %v1055_v21 }
  0x4d   :  { %443 = vmatpush.msrb.mxu0 %v125_v18 }
  0x4e   :  { %465 = vmatpush.msrb.mxu1 %v141_v27 }
  0x4f   :  { %444 = vmatpush.msrb.mxu0 %v124_v20 }
  0x50   :  { %466 = vmatpush.msrb.mxu1 %v140_v28 }
  0x51   :  { %445 = vmatpush.msrb.mxu0 %v123_v22 }
  0x52   :  { %467 = vmatpush.msrb.mxu1 %v139_v29 }
  0x53   :  { %446 = vmatpush.msrb.mxu0 %v122_v23 }
  0x54   :  { %468 = vmatpush.msrb.mxu1 %v138_v30 }
  0x55   :  { %447 = vmatpush.msrb.mxu0 %v121_v24  ;;  %v1229_v24 = vstv %s1171_s1  ;;  %s1401_s1 = sld [smem:[#allocation11 + $0x2]] }
  0x56   :  { %469 = vmatpush.msrb.mxu1 %v137_v31  ;;  %v1238_v31 = vstv %s1185_s6  ;;  %s1405_s6 = sld [smem:[#allocation11 + $0x4]] }
  0x57   :  { %448 = vmatpush.msrb.mxu0 %v120_v25 }
  0x58   :  { %470 = vmatpush.msrb.mxu1 %v136_v32  ;;  %v1241_v32 = vstv %s1181_s16  ;;  %s1403_s16 = sld [smem:[#allocation11 + $0x3]] }
  0xb5   :  { %v232_v34 = vpop.f32.mrf.mxu0 }
  0xb6   :  { %v233_v35 = vadd.f32 %v232_v34, %v1109_v33 }
  0xb8   :  { %v235_v36 = vmul.f32 0.5, %v233_v35 }
  0xba   :  { %741 = vtanh.f32 %v235_v36 }
  0xc0   :  { %v742_v37 = vpop.eup %741 }
  0xc1   :  { %253 = vmatmul.f32.vlgmr.msra.gmra.mxu1 %v742_v37 }
 0x13e   :  { %v254_v42 = vpop.f32.mrf.mxu1 }
 0x13f   :  { %v260_v47 = vmul.f32 %v1129_v38, %v254_v42  ;;  %v268_v48 = vmul.f32 %v1131_v39, %v254_v42  ;;  %v276_v49 = vmul.f32 %v1133_v40, %v254_v42  ;;  %v284_v50 = vmul.f32 %v1135_v41, %v254_v42 }
 0x140   :  { %v292_v57 = vmul.f32 %v1147_v46, %v254_v42  ;;  %v300_v0 = vmul.f32 %v1160_v52, %v254_v42  ;;  %v308_v4 = vmul.f32 %v1163_v53, %v254_v42  ;;  %v316_v10 = vmul.f32 %v1179_v60, %v254_v42 }
 0x141   :  { %v262_v54 = vadd.f32 %v1141_v43, %v260_v47  ;;  %v270_v55 = vadd.f32 %v1143_v44, %v268_v48  ;;  %v278_v56 = vadd.f32 %v1145_v45, %v276_v49  ;;  %v286_v63 = vadd.f32 %v1157_v51, %v284_v50 }
 0x142   :  { %v294_v7 = vadd.f32 %v1176_v59, %v292_v57  ;;  %v302_v16 = vadd.f32 %v1196_v3, %v300_v0  ;;  %v310_v18 = vadd.f32 %v1202_v8, %v308_v4  ;;  %v324_v23 = vmul.f32 %v1214_v12, %v254_v42 }
 0x143   :  { %v263_v61 = vmax.f32 %v262_v54, 0.0  ;;  %v271_v62 = vmax.f32 %v270_v55, 0.0  ;;  %v279_v6 = vmax.f32 %v278_v56, 0.0  ;;  %v287_v15 = vmax.f32 %v286_v63, 0.0 }
 0x144   :  { %v295_v22 = vmax.f32 %v294_v7, 0.0  ;;  %v318_v25 = vadd.f32 %v1211_v11, %v316_v10  ;;  %v303_v29 = vmax.f32 %v302_v16, 0.0  ;;  %v332_v30 = vmul.f32 %v1224_v19, %v254_v42 }
 0x145   :  { %v265_v5 = vmul.f32 %v1173_v58, %v263_v61  ;;  %v273_v14 = vmul.f32 %v1193_v2, %v271_v62  ;;  %v281_v21 = vmul.f32 %v1207_v9, %v279_v6  ;;  %v289_v28 = vmul.f32 %v1220_v17, %v287_v15 }
 0x146   :  { %v297_v35 = vmul.f32 %v1229_v24, %v295_v22  ;;  %v311_v36 = vmax.f32 %v310_v18, 0.0  ;;  %v326_v37 = vadd.f32 %v1233_v26, %v324_v23  ;;  %v1246_v47 = vstv %s1204_s4 }
 0x147   :  { %v266_v13 = vadd.f32 %v265_v5, %v1190_v1  ;;  %v305_v49 = vmul.f32 %v1238_v31, %v303_v29  ;;  %v319_v50 = vmax.f32 %v318_v25, 0.0  ;;  %v334_v54 = vadd.f32 %v1241_v32, %v332_v30 }
 0x148   :  { %v1250_v42 = vstv %s703_s9  ;;  %v313_v56 = vmul.f32 %v1246_v47, %v311_v36  ;;  %v327_v57 = vmax.f32 %v326_v37, 0.0  ;;  %v1253_v61 = vstv %s704_s11  ;;  %s1414_s11 = sld [smem:[#allocation11 + $0x6]] }
 0x149   :  { %v274_v20 = vadd.f32 %v273_v14, %v266_v13  ;;  %v321_v63 = vmul.f32 %v1250_v42, %v319_v50  ;;  %v335_v0 = vmax.f32 %v334_v54, 0.0  ;;  %v1256_v4 = vstv %s705_s12  ;;  %s1416_s12 = sld [smem:[#allocation12 + $0x1]] }
 0x14a   :  { %v329_v6 = vmul.f32 %v1253_v61, %v327_v57 }
 0x14b   :  { %v282_v27 = vadd.f32 %v281_v21, %v274_v20  ;;  %v337_v10 = vmul.f32 %v1256_v4, %v335_v0 }
 0x14d   :  { %v290_v34 = vadd.f32 %v289_v28, %v282_v27 }
 0x14f   :  { %v298_v48 = vadd.f32 %v297_v35, %v290_v34 }
 0x151   :  { %v306_v55 = vadd.f32 %v305_v49, %v298_v48 }
 0x153   :  { %v314_v62 = vadd.f32 %v313_v56, %v306_v55 }
 0x155   :  { %v322_v5 = vadd.f32 %v321_v63, %v314_v62 }
 0x157   :  { %v330_v7 = vadd.f32 %v329_v6, %v322_v5 }
 0x159   :  { %v338_v13 = vadd.f32 %v337_v10, %v330_v7 }
 0x15b   :  { %356 = vmatmul.f32.vlgmr.msra.gmra.mxu2 %v338_v13 }
 0x1de   :  { %v357_v14 = vpop.f32.mrf.mxu2 }
 0x1df   :  { %v358_v15 = vadd.f32 %v357_v14, %v1109_v33 }
 0x1e1   :  { %v360_v16 = vmul.f32 0.5, %v358_v15 }
 0x1e3   :  { %743 = vtanh.f32 %v360_v16 }
 0x1e9   :  { %v744_v18 = vpop.eup %743 }
 0x1ea   :  { %378 = vmatmul.f32.vlgmr.msra.gmra.mxu3 %v744_v18 }
 0x26d   :  { %v379_v20 = vpop.f32.mrf.mxu3 }
 0x26e   :  { %v382_v21 = vmul.f32 %v379_v20, %v1129_v38  ;;  %v387_v22 = vmul.f32 %v379_v20, %v1131_v39  ;;  %v392_v23 = vmul.f32 %v379_v20, %v1133_v40  ;;  %v397_v25 = vmul.f32 %v379_v20, %v1135_v41 }
 0x26f   :  { %v402_v30 = vmul.f32 %v379_v20, %v1147_v46  ;;  %v407_v37 = vmul.f32 %v379_v20, %v1160_v52  ;;  %v412_v48 = vmul.f32 %v379_v20, %v1163_v53  ;;  %v417_v55 = vmul.f32 %v379_v20, %v1179_v60 }
 0x270   :  { %v383_v27 = vadd.f32 %v382_v21, %v1141_v43  ;;  %v388_v28 = vadd.f32 %v387_v22, %v1143_v44  ;;  %v393_v29 = vadd.f32 %v392_v23, %v1145_v45  ;;  %v398_v36 = vadd.f32 %v397_v25, %v1157_v51 }
 0x271   :  { %v403_v54 = vadd.f32 %v402_v30, %v1176_v59  ;;  %v408_v63 = vadd.f32 %v407_v37, %v1196_v3  ;;  %v413_v0 = vadd.f32 %v412_v48, %v1202_v8  ;;  %v422_v10 = vmul.f32 %v379_v20, %v1214_v12 }
 0x272   :  { %v384_v34 = vmax.f32 %v383_v27, 0.0  ;;  %v389_v35 = vmax.f32 %v388_v28, 0.0  ;;  %v394_v50 = vmax.f32 %v393_v29, 0.0  ;;  %v399_v62 = vmax.f32 %v398_v36, 0.0 }
 0x273   :  { %v404_v7 = vmax.f32 %v403_v54, 0.0  ;;  %v418_v14 = vadd.f32 %v417_v55, %v1211_v11  ;;  %v409_v18 = vmax.f32 %v408_v63, 0.0  ;;  %v427_v21 = vmul.f32 %v379_v20, %v1224_v19 }
 0x274   :  { %v385_v49 = vmul.f32 %v384_v34, %v1173_v58  ;;  %v390_v57 = vmul.f32 %v389_v35, %v1193_v2  ;;  %v395_v6 = vmul.f32 %v394_v50, %v1207_v9  ;;  %v400_v16 = vmul.f32 %v399_v62, %v1220_v17 }
 0x275   :  { %v405_v23 = vmul.f32 %v404_v7, %v1229_v24  ;;  %v414_v25 = vmax.f32 %v413_v0, 0.0  ;;  %v423_v27 = vadd.f32 %v422_v10, %v1233_v26  ;;  %v410_v29 = vmul.f32 %v409_v18, %v1238_v31  ;;  %v546_v7 = vld [vmem:[%s1474_s2 + $0x78] sm:$0xff]  ;;  %v545_v10 = vld [vmem:[%s1474_s2 + $0x70] sm:$0xff]  ;;  %v539_v18 = vld [vmem:[%s1474_s2 + $0x40] sm:$0xff] }
 0x276   :  { %v386_v56 = vadd.f32 %v385_v49, %v1190_v1  ;;  %v419_v30 = vmax.f32 %v418_v14, 0.0  ;;  %v428_v34 = vadd.f32 %v427_v21, %v1241_v32  ;;  %548 = vmatpush.msrb.mxu2 %v546_v7  ;;  %v542_v14 = vld [vmem:[%s1474_s2 + $0x58] sm:$0xff] }
 0x277   :  { %v415_v36 = vmul.f32 %v414_v25, %v1246_v47  ;;  %v424_v37 = vmax.f32 %v423_v27, 0.0  ;;  %v538_v21 = vld [vmem:[%s1474_s2 + $0x38] sm:$0xff]  ;;  %v535_v25 = vld [vmem:[%s1474_s2 + $0x20] sm:$0xff] }
 0x278   :  { %v391_v5 = vadd.f32 %v390_v57, %v386_v56  ;;  %v420_v49 = vmul.f32 %v419_v30, %v1250_v42  ;;  %v429_v20 = vmax.f32 %v428_v34, 0.0  ;;  %549 = vmatpush.msrb.mxu2 %v545_v10  ;;  %v534_v27 = vld [vmem:[%s1474_s2 + $0x18] sm:$0xff] }
 0x279   :  { %v425_v54 = vmul.f32 %v424_v37, %v1253_v61 }
 0x27a   :  { %v396_v15 = vadd.f32 %v395_v6, %v391_v5  ;;  %v430_v56 = vmul.f32 %v429_v20, %v1256_v4 }
 0x27c   :  { %v401_v22 = vadd.f32 %v400_v16, %v396_v15  ;;  %v541_v15 = vld [vmem:[%s1474_s2 + $0x50] sm:$0xff]  ;;  %v540_v16 = vld [vmem:[%s1474_s2 + $0x48] sm:$0xff] }
 0x27e   :  { %v406_v28 = vadd.f32 %v405_v23, %v401_v22  ;;  %v537_v22 = vld [vmem:[%s1474_s2 + $0x30] sm:$0xff]  ;;  %v536_v23 = vld [vmem:[%s1474_s2 + $0x28] sm:$0xff] }
 0x280   :  { %v411_v35 = vadd.f32 %v410_v29, %v406_v28  ;;  %v533_v28 = vld [vmem:[%s1474_s2 + $0x10] sm:$0xff]  ;;  %v532_v29 = vld [vmem:[%s1474_s2 + $0x8] sm:$0xff] }
 0x282   :  { %v416_v48 = vadd.f32 %v415_v36, %v411_v35 }
 0x284   :  { %v421_v50 = vadd.f32 %v420_v49, %v416_v48  ;;  %v531_v48 = vld [vmem:[%s1474_s2] sm:$0xff] }
 0x286   :  { %v426_v55 = vadd.f32 %v425_v54, %v421_v50 }
 0x288   :  { %v431_v57 = vadd.f32 %v430_v56, %v426_v55 }
 0x28a   :  { %v1292_v62 = vadd.f32 %v431_v57, %v338_v13  ;;  %v544_v13 = vld [vmem:[%s1474_s2 + $0x68] sm:$0xff] }
 0x28b   :  { %550 = vmatpush.msrb.mxu2 %v544_v13 }
 0x28c   :  { %449 = vmatmul.f32.vlgmr.msrb.gmra.mxu0 %v1292_v62 }
 0x309   :  { %v450_v63 = vpop.f32.mrf.mxu0 }
 0x30a   :  { %v451_v0 = vadd.f32 %v450_v63, %v1109_v33  ;;  %v543_v33 = vld [vmem:[%s1474_s2 + $0x60] sm:$0xff]  ;;  %s1446_s2 = sld [smem:[#allocation12 + $0x5]] }
 0x30b   :  { %551 = vmatpush.msrb.mxu2 %v543_v33 }
 0x30c   :  { %v453_v5 = vmul.f32 0.5, %v451_v0 }
 0x30d   :  { %552 = vmatpush.msrb.mxu2 %v542_v14 }
 0x30e   :  { %745 = vtanh.f32 %v453_v5 }
 0x30f   :  { %553 = vmatpush.msrb.mxu2 %v541_v15 }
 0x311   :  { %554 = vmatpush.msrb.mxu2 %v540_v16 }
 0x313   :  { %555 = vmatpush.msrb.mxu2 %v539_v18 }
 0x314   :  { %v746_v6 = vpop.eup %745 }
 0x315   :  { %471 = vmatmul.f32.vlgmr.msrb.gmra.mxu1 %v746_v6  ;;  %556 = vmatpush.msrb.mxu2 %v538_v21 }
 0x317   :  { %557 = vmatpush.msrb.mxu2 %v537_v22 }
 0x319   :  { %558 = vmatpush.msrb.mxu2 %v536_v23 }
 0x31b   :  { %559 = vmatpush.msrb.mxu2 %v535_v25  ;;  %v594_v25 = vstv %s1385_s26  ;;  %s732_s26 = sld [smem:[#allocation12 + $0x9]] }
 0x31d   :  { %560 = vmatpush.msrb.mxu2 %v534_v27 }
 0x31f   :  { %561 = vmatpush.msrb.mxu2 %v533_v28  ;;  %v572_v28 = vstv %s1397_s30 }
 0x321   :  { %562 = vmatpush.msrb.mxu2 %v532_v29  ;;  %v580_v29 = vstv %s1399_s15 }
 0x323   :  { %563 = vmatpush.msrb.mxu2 %v531_v48 }
 0x392   :  { %v472_v30 = vpop.f32.mrf.mxu1 }
 0x393   :  { %v475_v34 = vmul.f32 %v472_v30, %v1129_v38  ;;  %v480_v35 = vmul.f32 %v472_v30, %v1131_v39  ;;  %v485_v36 = vmul.f32 %v472_v30, %v1133_v40  ;;  %v490_v37 = vmul.f32 %v472_v30, %v1135_v41 }
 0x394   :  { %v495_v54 = vmul.f32 %v472_v30, %v1147_v46  ;;  %v500_v41 = vmul.f32 %v472_v30, %v1160_v52  ;;  %v505_v55 = vmul.f32 %v472_v30, %v1163_v53 }
 0x395   :  { %v476_v49 = vadd.f32 %v475_v34, %v1141_v43  ;;  %v481_v20 = vadd.f32 %v480_v35, %v1143_v44  ;;  %v486_v50 = vadd.f32 %v485_v36, %v1145_v45  ;;  %v491_v40 = vadd.f32 %v490_v37, %v1157_v51 }
 0x396   :  { %v496_v43 = vadd.f32 %v495_v54, %v1176_v59  ;;  %v510_v44 = vmul.f32 %v472_v30, %v1179_v60  ;;  %v501_v0 = vadd.f32 %v500_v41, %v1196_v3  ;;  %v506_v51 = vadd.f32 %v505_v55, %v1202_v8 }
 0x397   :  { %v477_v38 = vmax.f32 %v476_v49, 0.0  ;;  %v482_v39 = vmax.f32 %v481_v20, 0.0  ;;  %v487_v57 = vmax.f32 %v486_v50, 0.0  ;;  %v492_v63 = vmax.f32 %v491_v40, 0.0 }
 0x398   :  { %v497_v53 = vmax.f32 %v496_v43, 0.0  ;;  %v511_v6 = vadd.f32 %v510_v44, %v1211_v11  ;;  %v502_v7 = vmax.f32 %v501_v0, 0.0  ;;  %v507_v3 = vmax.f32 %v506_v51, 0.0 }
 0x399   :  { %v478_v56 = vmul.f32 %v477_v38, %v1173_v58  ;;  %v483_v46 = vmul.f32 %v482_v39, %v1193_v2  ;;  %v488_v52 = vmul.f32 %v487_v57, %v1207_v9  ;;  %v515_v58 = vmul.f32 %v472_v30, %v1214_v12 }
 0x39a   :  { %v493_v60 = vmul.f32 %v492_v63, %v1220_v17  ;;  %v498_v10 = vmul.f32 %v497_v53, %v1229_v24  ;;  %v503_v9 = vmul.f32 %v502_v7, %v1238_v31  ;;  %v512_v33 = vmax.f32 %v511_v6, 0.0  ;;  %v740_v31 = vld [vmem:[%s1475_s3] ss:$0 sm:$0xff]  ;;  %s1393_s3 = sld [smem:[#allocation9 + $0x7]] }
 0x39b   :  { %v479_v45 = vadd.f32 %v478_v56, %v1190_v1  ;;  %v520_v1 = vmul.f32 %v472_v30, %v1224_v19  ;;  %v516_v8 = vadd.f32 %v515_v58, %v1233_v26  ;;  %v508_v11 = vmul.f32 %v507_v3, %v1246_v47  ;;  %v547_v47 = vld [vmem:[%s1477_s5] sm:$0xff]  ;;  %s1430_s5 = sld [smem:[#allocation9 + $0x9]] }
 0x39c   :  { %v513_v16 = vmul.f32 %v512_v33, %v1250_v42  ;;  %v588_v30 = vstv %s1401_s1  ;;  %v602_v34 = vstv %s1387_s27  ;;  %v596_v49 = vstv %s1403_s16 }
 0x39d   :  { %v484_v5 = vadd.f32 %v483_v46, %v479_v45  ;;  %v521_v12 = vadd.f32 %v520_v1, %v1241_v32  ;;  %v517_v15 = vmax.f32 %v516_v8, 0.0  ;;  %v610_v20 = vstv %s1389_s10 }
 0x39e   :  { %v618_v50 = vstv %s1391_s28  ;;  %v575_v41 = vstv %s1409_s8  ;;  %v604_v55 = vstv %s1405_s6  ;;  %v568_v46 = vstv %s1485_s13  ;;  %s1459_s13 = sld [smem:[#allocation12 + $0x7]] }
 0x39f   :  { %v489_v59 = vadd.f32 %v488_v52, %v484_v5  ;;  %v522_v19 = vmax.f32 %v521_v12, 0.0  ;;  %v518_v24 = vmul.f32 %v517_v15, %v1253_v61  ;;  %v570_v61 = vstv %s1379_s24 }
 0x3a0   :  { %v626_v56 = vstv %s1393_s3  ;;  %v583_v63 = vstv %s1416_s12  ;;  %v612_v0 = vstv %s1407_s17  ;;  %v620_v58 = vstv %s1414_s11 }
 0x3a1   :  { %v494_v2 = vadd.f32 %v493_v60, %v489_v59  ;;  %v523_v26 = vmul.f32 %v522_v19, %v1256_v4  ;;  %v578_v4 = vstv %s1381_s25  ;;  %s1454_s25 = sld [smem:[#allocation12 + $0x6]]  ;;  %v591_v6 = vstv %s1424_s19 }
 0x3a2   :  { %v628_v60 = vstv %s1422_s18  ;;  %v634_v7 = vstv %s1395_s29  ;;  %v599_v8 = vstv %s1432_s20  ;;  %v607_v15 = vstv %s1439_s22 }
 0x3a3   :  { %v499_v13 = vadd.f32 %v498_v10, %v494_v2 }
 0x3a5   :  { %v504_v14 = vadd.f32 %v503_v9, %v499_v13  ;;  %v642_v9 = vstv %s1430_s5 }
 0x3a7   :  { %v509_v17 = vadd.f32 %v508_v11, %v504_v14 }
 0x3a9   :  { %v514_v18 = vadd.f32 %v513_v16, %v509_v17  ;;  %v636_v16 = vstv %s1437_s21 }
 0x3ab   :  { %v519_v21 = vadd.f32 %v518_v24, %v514_v18 }
 0x3ad   :  { %v524_v22 = vadd.f32 %v523_v26, %v519_v21  ;;  %v615_v26 = vstv %s1446_s2 }
 0x3af   :  { %v525_v32 = vadd.f32 %v524_v22, %v1292_v62  ;;  %v586_v62 = vstv %s1383_s7  ;;  %s731_s7 = sld [smem:[#allocation12 + $0x8]]  ;;  %v644_v22 = vstv %s1444_s0 }
 0x3b1   :  { %v530_v23 = vmul.f32 %v740_v31, %v525_v32 }
 0x3b3   :  { %564 = vmatmul.f32.vlgmr.msrb.gmra.mxu2 %v530_v23 }
 0x436   :  { %v565_v42 = vpop.f32.mrf.mxu2 }
 0x437   :  { %v566_v27 = vadd.f32 %v565_v42, %v547_v47  ;;  %v623_v42 = vstv %s1454_s25 }
 0x439   :  { %v571_v35 = vmul.f32 %v570_v61, %v566_v27  ;;  %v579_v36 = vmul.f32 %v578_v4, %v566_v27  ;;  %v587_v37 = vmul.f32 %v586_v62, %v566_v27  ;;  %v595_v48 = vmul.f32 %v594_v25, %v566_v27 }
 0x43a   :  { %v603_v40 = vmul.f32 %v602_v34, %v566_v27  ;;  %v611_v45 = vmul.f32 %v610_v20, %v566_v27  ;;  %v619_v51 = vmul.f32 %v618_v50, %v566_v27  ;;  %v627_v59 = vmul.f32 %v626_v56, %v566_v27 }
 0x43b   :  { %v573_v54 = vadd.f32 %v572_v28, %v571_v35  ;;  %v581_v38 = vadd.f32 %v580_v29, %v579_v36  ;;  %v589_v39 = vadd.f32 %v588_v30, %v587_v37  ;;  %v597_v44 = vadd.f32 %v596_v49, %v595_v48 }
 0x43c   :  { %v605_v53 = vadd.f32 %v604_v55, %v603_v40  ;;  %v613_v3 = vadd.f32 %v612_v0, %v611_v45  ;;  %v621_v13 = vadd.f32 %v620_v58, %v619_v51  ;;  %v635_v11 = vmul.f32 %v634_v7, %v566_v27 }
 0x43d   :  { %v574_v57 = vmax.f32 %v573_v54, 0.0  ;;  %v582_v43 = vmax.f32 %v581_v38, 0.0  ;;  %v590_v52 = vmax.f32 %v589_v39, 0.0  ;;  %v598_v10 = vmax.f32 %v597_v44, 0.0 }
 0x43e   :  { %v606_v14 = vmax.f32 %v605_v53, 0.0  ;;  %v629_v17 = vadd.f32 %v628_v60, %v627_v59  ;;  %v614_v24 = vmax.f32 %v613_v3, 0.0  ;;  %v643_v21 = vmul.f32 %v642_v9, %v566_v27 }
 0x43f   :  { %v576_v5 = vmul.f32 %v575_v41, %v574_v57  ;;  %v584_v2 = vmul.f32 %v583_v63, %v582_v43  ;;  %v592_v12 = vmul.f32 %v591_v6, %v590_v52  ;;  %v600_v18 = vmul.f32 %v599_v8, %v598_v10 }
 0x440   :  { %v608_v32 = vmul.f32 %v607_v15, %v606_v14  ;;  %v622_v23 = vmax.f32 %v621_v13, 0.0  ;;  %v637_v47 = vadd.f32 %v636_v16, %v635_v11  ;;  %v616_v4 = vmul.f32 %v615_v26, %v614_v24 }
 0x441   :  { %v577_v1 = vadd.f32 %v576_v5, %v568_v46  ;;  %v630_v62 = vmax.f32 %v629_v17, 0.0  ;;  %v645_v25 = vadd.f32 %v644_v22, %v643_v21  ;;  %v631_v28 = vstv %s1459_s13 }
 0x442   :  { %v624_v30 = vmul.f32 %v623_v42, %v622_v23  ;;  %v638_v34 = vmax.f32 %v637_v47, 0.0  ;;  %v639_v35 = vstv %s731_s7  ;;  %v647_v48 = vstv %s732_s26 }
 0x443   :  { %v585_v33 = vadd.f32 %v584_v2, %v577_v1  ;;  %v632_v37 = vmul.f32 %v631_v28, %v630_v62  ;;  %v646_v27 = vmax.f32 %v645_v25, 0.0 }
 0x444   :  { %v640_v20 = vmul.f32 %v639_v35, %v638_v34 }
 0x445   :  { %v593_v19 = vadd.f32 %v592_v12, %v585_v33  ;;  %v648_v54 = vmul.f32 %v647_v48, %v646_v27 }
 0x447   :  { %v601_v31 = vadd.f32 %v600_v18, %v593_v19 }
 0x449   :  { %v609_v61 = vadd.f32 %v608_v32, %v601_v31 }
 0x44b   :  { %v617_v29 = vadd.f32 %v616_v4, %v609_v61 }
 0x44d   :  { %v625_v36 = vadd.f32 %v624_v30, %v617_v29 }
 0x44f   :  { %v633_v49 = vadd.f32 %v632_v37, %v625_v36 }
 0x451   :  { %v641_v50 = vadd.f32 %v640_v20, %v633_v49 }
 0x453   :  { %v649_v38 = vadd.f32 %v648_v54, %v641_v50 }
 0x455   :  { %v650_v39 = vmul.f32 1.442695, %v649_v38 }
 0x457   :  { %747 = vpow2.f32 %v650_v39 }
 0x45d   :  { %v748_v40 = vpop.eup %747 }
 0x45e   :  { %v652_v41 = vadd.f32 1.0, %v748_v40 }
 0x460   :  { %749 = vrcp.f32 %v652_v41  ;;  %v664_v43 = vand.u32 2147483648, %v652_v41  ;;  %v662_v45 = vand.u32 2147483647, %v652_v41  ;;  %vm658_vm1 = vweird.f32 %v652_v41 }
 0x462   :  { %v665_v63 = vor.u32 1.1754944e-38, %v664_v43  ;;  %vm663_vm3 = vcmp.eq.f32.partialorder %v662_v45, 8.507059e+37 }
 0x466   :  { %v750_v55 = vpop.eup %749 }
 0x467   :  { %v654_v56 = vmul.f32 %v750_v55, %v652_v41  ;;  %vm659_vm0 = vweird.f32 %v750_v55 }
 0x468   :  { %vm660_vm2 = vmor %vm658_vm1, %vm659_vm0 }
 0x469   :  { %v655_v57 = vsub.f32 1.0, %v654_v56 }
 0x46b   :  { %v656_v44 = vmul.f32 %v750_v55, %v655_v57 }
 0x46d   :  { %v657_v46 = vadd.f32 %v750_v55, %v656_v44 }
 0x46f   :  { %v661_v0 = vsel %vm660_vm2, %v750_v55, %v657_v46 }
 0x470   :  { %v666_v51 = vsel %vm663_vm3, %v665_v63, %v661_v0 }
 0x471   :  { %v668_v5 = vmax.f32 %v666_v51, 1e-07 }
 0x473   :  { %v669_v52 = vmin.f32 %v668_v5, 0.9999999 }
 0x475   :  { %670 = vst [vmem:[%s1486_s14] sm:$0xff] %v669_v52 }
 0x476   :  { %675 = vsyncpa [#allocation5], 1 }
 0x477   :  { %676 = vsyncpa [#allocation7], 1 }
 0x478   :  { %677 = vsyncpa [#allocation10], 1 }
 0x479   :  { %678 = vsyncpa [#allocation13], 1 }

</bundles_post_ra>
